<compile_context>
chip_gen: v6e
topology: v6e:2x2x1
jax: 0.10.0
libtpu: 0.0.40
codegen_flags: <defaults>
</compile_context>

<pallas_src>
import math
import jax
import jax.numpy as jnp
from jax.experimental import pallas as pl
from jax.experimental.pallas import tpu as pltpu


BN_EPS = 1e-3                 # matches nn.BatchNorm1d(channels, eps=0.001)
_TARGET_ROWS = 2048           # flattened (batch, length) rows aimed at per grid step
_MXU_DTYPE = jnp.bfloat16     # MXU operand dtype; accumulation stays f32
_VMEM_LIMIT_BYTES = 48 * 1024 * 1024   # fits v7x (64 MiB phys) and v5e/v6e (128 MiB)


# ----------------------------------------------------------------------------
# Fused kernel: initial conv -> num_blocks x [BN+ReLU -> conv -> BN+ReLU -> conv
# -> +residual] -> final conv.  One grid step processes `rows` = bt*L flattened
# (batch, length) rows.  INVARIANT: every row tile starts on a batch boundary
# (rows is an exact multiple of L) -- the in-kernel masks rely on it.
# ----------------------------------------------------------------------------
def _make_fused_kernel(num_blocks, K, pad_l, L, rows, mxu_dtype):
    def kernel(x_ref, wi_ref, bi_ref,
               s0_ref, t0_ref, w0_ref,
               s1_ref, t1_ref, w1_ref, b1_ref,
               wf_ref, bf_ref, out_ref):
        # Per-tap validity masks built once per step from the row index (VPU
        # iota + compare); reused by every conv in the net.  They zero both the
        # out-of-range 'same'-padding taps and any cross-batch leakage at the
        # flattened row boundaries.
        l_idx = jax.lax.broadcasted_iota(jnp.int32, (rows, 1), 0) % L
        masks = []
        for k in range(K):
            s = k - pad_l
            if s == 0:
                masks.append(None)        # centre tap is always in-range
            else:
                pos = l_idx + s
                masks.append(((pos >= 0) & (pos < L)).astype(jnp.float32))

        def conv(t, wsel, bias):
            # 'same' conv as K small MXU matmuls accumulated in f32: no im2col
            # concat / full-width cast materialisation.  wsel(k) -> (C, Cout)
            # bf16 weight slab for tap k (VMEM-resident).
            acc = None
            for k in range(K):
                s = k - pad_l
                # jnp.roll with a static shift = two static slices + concat
                # along sublanes; wrap-around rows are killed by the mask.
                tap = t if s == 0 else jnp.roll(t, -s, axis=0)
                if masks[k] is not None:
                    tap = tap * masks[k]
                part = jnp.dot(tap.astype(mxu_dtype), wsel(k),
                               preferred_element_type=jnp.float32)
                acc = part if acc is None else acc + part
            return acc if bias is None else acc + bias

        h = conv(x_ref[...], lambda k: wi_ref[k], bi_ref[...])        # initial conv
        # Static unroll; TODO(synk): switch to lax.fori_loop for num_blocks >> 4
        # (bounds vreg live ranges).
        for blk in range(num_blocks):
            a = jnp.maximum(h * s0_ref[blk] + t0_ref[blk], 0.0)       # BN0(eval)+ReLU, f32 VPU
            a = conv(a, lambda k, b=blk: w0_ref[b, k], None)          # conv0 (bias folded into BN1)
            a = jnp.maximum(a * s1_ref[blk] + t1_ref[blk], 0.0)       # BN1(eval)+ReLU (+ folded b0)
            # TODO(synk): dropout is identity here (eval mode).
            a = conv(a, lambda k, b=blk: w1_ref[b, k], b1_ref[blk])   # conv1
            h = h + a                                                  # residual
        # Only HBM store of the whole net.
        out_ref[...] = conv(h, lambda k: wf_ref[k], bf_ref[...]).astype(out_ref.dtype)

    return kernel


def _fold_bn(bn):
    scale = bn["gamma"] / jnp.sqrt(bn["var"] + BN_EPS)
    shift = bn["beta"] - bn["mean"] * scale
    return scale, shift


# ----------------------------------------------------------------------------
# Wrapper: layout plumbing + single pallas_call
# ----------------------------------------------------------------------------
def conv_residual_net_forward(params, x_ncl, *, mxu_dtype=_MXU_DTYPE):
    """x_ncl: (N, C_in, L) — PyTorch NCL layout in and out."""
    N, Cin, L = x_ncl.shape
    H = params["initial"]["w"].shape[0]
    Cout = params["final"]["w"].shape[0]
    K = params["initial"]["w"].shape[2]
    assert K % 2 == 1, "padding='same' path implemented for odd kernel_size"
    pad_l = (K - 1) // 2
    nb = len(params["blocks"])
    nbs = max(nb, 1)

    # ---- batch tiling: flatten (N, L) into one row axis, bt batch elems / step ----
    m = 8 // math.gcd(L, 8)                      # smallest bt so bt*L is sublane-aligned
    bt = max(1, _TARGET_ROWS // max(L, 1))
    bt = min(bt, max(1, (N + 1) // 2))           # >= 2 grid steps when N > 1 (v7x 2 TCs)
    bt = -(-bt // m) * m                         # round UP; pad batch rows, never collapse
    n_pad = -(-N // bt) * bt
    rows = bt * L
    grid = n_pad // bt
    assert rows % L == 0                         # every tile starts on a batch boundary

    x = x_ncl.astype(jnp.float32)
    if n_pad != N:
        x = jnp.concatenate([x, jnp.zeros((n_pad - N, Cin, L), jnp.float32)], axis=0)
    x_rows = jnp.transpose(x, (0, 2, 1)).reshape(n_pad * L, Cin)   # NCL -> NLC -> rows

    # ---- fold BN (eval); weights per tap: (Cout, Cin, K) -> (K, Cin, Cout) bf16 ----
    def w_taps(w_oik):
        return jnp.transpose(w_oik, (2, 1, 0)).astype(mxu_dtype)

    def row(v):
        return v.reshape(1, -1).astype(jnp.float32)

    wi, bi = w_taps(params["initial"]["w"]), row(params["initial"]["b"])
    wf, bf = w_taps(params["final"]["w"]), row(params["final"]["b"])

    if nb > 0:
        s0, t0, w0, s1, t1, w1, b1 = [], [], [], [], [], [], []
        for blk in params["blocks"]:
            sc0, sh0 = _fold_bn(blk["bn0"])
            sc1, sh1 = _fold_bn(blk["bn1"])
            s0.append(row(sc0)); t0.append(row(sh0))
            w0.append(w_taps(blk["conv0"]["w"]))
            # fold conv0 bias into BN1 shift: (y + b0)*s1 + t1 == y*s1 + (t1 + b0*s1)
            s1.append(row(sc1)); t1.append(row(sh1 + blk["conv0"]["b"] * sc1))
            w1.append(w_taps(blk["conv1"]["w"])); b1.append(row(blk["conv1"]["b"]))
        s0, t0, s1, t1, b1 = map(jnp.stack, (s0, t0, s1, t1, b1))
        w0, w1 = jnp.stack(w0), jnp.stack(w1)
    else:  # dummies; kernel block loop has zero trips and never reads them
        s0 = t0 = s1 = t1 = b1 = jnp.zeros((1, 1, H), jnp.float32)
        w0 = w1 = jnp.zeros((1, K, H, H), mxu_dtype)

    def resident(shape):
        # Weights/scales: constant index_map -> fetched once, VMEM-resident.
        # (Mosaic may still double-buffer these tiny tiles; negligible at these
        # sizes -- revisit with pipeline_mode=pl.Buffered(1) at production H.)
        n = len(shape)
        return pl.BlockSpec(shape, lambda i, _n=n: (0,) * _n)

    in_specs = [
        pl.BlockSpec((rows, Cin), lambda i: (i, 0)),          # x row tile
        resident((K, Cin, H)), resident((1, H)),              # initial conv w, b
        resident((nbs, 1, H)), resident((nbs, 1, H)),         # BN0 scale, shift
        resident((nbs, K, H, H)),                             # conv0 w (bias folded)
        resident((nbs, 1, H)), resident((nbs, 1, H)),         # BN1 scale, shift(+b0*s1)
        resident((nbs, K, H, H)), resident((nbs, 1, H)),      # conv1 w, b
        resident((K, H, Cout)), resident((1, Cout)),          # final conv w, b
    ]

    out_rows = pl.pallas_call(
        _make_fused_kernel(nb, K, pad_l, L, rows, mxu_dtype),
        out_shape=jax.ShapeDtypeStruct((n_pad * L, Cout), jnp.float32),
        grid=(grid,),
        in_specs=in_specs,
        out_specs=pl.BlockSpec((rows, Cout), lambda i: (i, 0)),
        compiler_params=pltpu.CompilerParams(
            dimension_semantics=("parallel",),       # batch tiles are independent
            vmem_limit_bytes=_VMEM_LIMIT_BYTES),
    )(x_rows, wi, bi, s0, t0, w0, s1, t1, w1, b1, wf, bf)

    out = out_rows.reshape(n_pad, L, Cout)[:N]
    return jnp.transpose(out, (0, 2, 1))   # back to NCL


# ----------------------------------------------------------------------------
# Parameter construction (deterministic, shapes match the PyTorch module)
# ----------------------------------------------------------------------------
def _conv_params(key, cin, cout, ksz, zero_init=False):
    kw, kb = jax.random.split(key)
    if zero_init:
        w = jax.random.uniform(kw, (cout, cin, ksz), jnp.float32, -0.001, 0.001)
        b = jax.random.uniform(kb, (cout,), jnp.float32, -0.001, 0.001)
    else:
        bound = 1.0 / jnp.sqrt(cin * ksz)
        w = jax.random.uniform(kw, (cout, cin, ksz), jnp.float32, -bound, bound)
        b = jax.random.uniform(kb, (cout,), jnp.float32, -bound, bound)
    return {"w": w, "b": b}


def _bn_params(key, c):
    k1, k2, k3 = jax.random.split(key, 3)
    return {
        "gamma": 1.0 + 0.1 * jax.random.normal(k1, (c,), jnp.float32),
        "beta": 0.1 * jax.random.normal(k2, (c,), jnp.float32),
        "mean": 0.1 * jax.random.normal(k3, (c,), jnp.float32),
        "var": jnp.ones((c,), jnp.float32) * 0.9,
    }


def init_conv_residual_net(key, in_channels, out_channels, hidden_channels,
                           num_blocks, kernel_size):
    keys = jax.random.split(key, 2 + num_blocks)
    params = {
        "initial": _conv_params(keys[0], in_channels, hidden_channels, kernel_size),
        "final": _conv_params(keys[1], hidden_channels, out_channels, kernel_size),
        "blocks": [],
    }
    for i in range(num_blocks):
        bk = jax.random.split(keys[2 + i], 4)
        params["blocks"].append({
            "bn0": _bn_params(bk[0], hidden_channels),
            "conv0": _conv_params(bk[1], hidden_channels, hidden_channels, kernel_size),
            "bn1": _bn_params(bk[2], hidden_channels),
            "conv1": _conv_params(bk[3], hidden_channels, hidden_channels, kernel_size,
                                  zero_init=True),
        })
    return params


# ----------------------------------------------------------------------------
# Pure-JAX reference (correctness check; same bf16-operand rounding as the kernel)
# ----------------------------------------------------------------------------
def _ref_conv(x_ncl, w_oik, b, mxu_dtype=_MXU_DTYPE):
    y = jax.lax.conv_general_dilated(
        x_ncl.astype(mxu_dtype), w_oik.astype(mxu_dtype),
        window_strides=(1,), padding="SAME",
        dimension_numbers=("NCH", "OIH", "NCH"),
        preferred_element_type=jnp.float32)
    return y + b.astype(jnp.float32)[None, :, None]


def _ref_bn(x_ncl, bn):
    scale, shift = _fold_bn(bn)
    return x_ncl * scale[None, :, None] + shift[None, :, None]


def ref_forward(params, x_ncl):
    t = _ref_conv(x_ncl.astype(jnp.float32), params["initial"]["w"], params["initial"]["b"])
    for blk in params["blocks"]:
        h = jax.nn.relu(_ref_bn(t, blk["bn0"]))
        h = _ref_conv(h, blk["conv0"]["w"], blk["conv0"]["b"])
        h = jax.nn.relu(_ref_bn(h, blk["bn1"]))
        h = _ref_conv(h, blk["conv1"]["w"], blk["conv1"]["b"])
        t = t + h
    return _ref_conv(t, params["final"]["w"], params["final"]["b"])


# ----------------------------------------------------------------------------
if __name__ == "__main__":
    batch, in_ch, out_ch, hidden, num_blocks, ksz, length = 2, 4, 4, 32, 2, 3, 16

    key = jax.random.PRNGKey(0)
    kx, kp = jax.random.split(key)
    x = jax.random.normal(kx, (batch, in_ch, length), jnp.float32)   # NCL
    params = init_conv_residual_net(kp, in_ch, out_ch, hidden, num_blocks, ksz)

    out = jax.block_until_ready(conv_residual_net_forward(params, x))
    ref = jax.block_until_ready(ref_forward(params, x))

    assert out.shape == (batch, out_ch, length)
    max_err = float(jnp.max(jnp.abs(out - ref)))
    assert jnp.allclose(out, ref, atol=1e-2, rtol=1e-2), f"max abs err {max_err}"

    print("KERNEL_OK")
</pallas_src>

<mosaic_0001>
module attributes {stable_mosaic.version = 11 : i64} {
  func.func @kernel(%arg0: i32, %arg1: memref<16x4xf32, #tpu.memory_space<vmem>>, %arg2: memref<3x4x32xbf16, #tpu.memory_space<vmem>>, %arg3: memref<1x32xf32, #tpu.memory_space<vmem>>, %arg4: memref<2x1x32xf32, #tpu.memory_space<vmem>>, %arg5: memref<2x1x32xf32, #tpu.memory_space<vmem>>, %arg6: memref<2x3x32x32xbf16, #tpu.memory_space<vmem>>, %arg7: memref<2x1x32xf32, #tpu.memory_space<vmem>>, %arg8: memref<2x1x32xf32, #tpu.memory_space<vmem>>, %arg9: memref<2x3x32x32xbf16, #tpu.memory_space<vmem>>, %arg10: memref<2x1x32xf32, #tpu.memory_space<vmem>>, %arg11: memref<3x32x4xbf16, #tpu.memory_space<vmem>>, %arg12: memref<1x4xf32, #tpu.memory_space<vmem>>, %arg13: memref<16x4xf32, #tpu.memory_space<vmem>>) attributes {dimension_semantics = [#tpu.dimension_semantics<parallel>], iteration_bounds = array<i64: 2>, scalar_prefetch = 0 : i64, scratch_operands = 0 : i64, tpu.core_type = #tpu.core_type<tc>, window_params = [{transform_indices = @transform_0, window_bounds = array<i64: 16, 4>}, {pipeline_mode = #tpu.pipeline_mode<synchronous>, transform_indices = @transform_1, window_bounds = array<i64: 3, 4, 32>}, {pipeline_mode = #tpu.pipeline_mode<synchronous>, transform_indices = @transform_2, window_bounds = array<i64: 1, 32>}, {pipeline_mode = #tpu.pipeline_mode<synchronous>, transform_indices = @transform_3, window_bounds = array<i64: 2, 1, 32>}, {pipeline_mode = #tpu.pipeline_mode<synchronous>, transform_indices = @transform_4, window_bounds = array<i64: 2, 1, 32>}, {pipeline_mode = #tpu.pipeline_mode<synchronous>, transform_indices = @transform_5, window_bounds = array<i64: 2, 3, 32, 32>}, {pipeline_mode = #tpu.pipeline_mode<synchronous>, transform_indices = @transform_6, window_bounds = array<i64: 2, 1, 32>}, {pipeline_mode = #tpu.pipeline_mode<synchronous>, transform_indices = @transform_7, window_bounds = array<i64: 2, 1, 32>}, {pipeline_mode = #tpu.pipeline_mode<synchronous>, transform_indices = @transform_8, window_bounds = array<i64: 2, 3, 32, 32>}, {pipeline_mode = #tpu.pipeline_mode<synchronous>, transform_indices = @transform_9, window_bounds = array<i64: 2, 1, 32>}, {pipeline_mode = #tpu.pipeline_mode<synchronous>, transform_indices = @transform_10, window_bounds = array<i64: 3, 32, 4>}, {pipeline_mode = #tpu.pipeline_mode<synchronous>, transform_indices = @transform_11, window_bounds = array<i64: 1, 4>}, {transform_indices = @transform_12, window_bounds = array<i64: 16, 4>}]} {
    %0 = tpu.iota {dimensions = array<i32: 0>} : vector<16x1xi32>
    %c16_i32 = arith.constant 16 : i32
    %c0_i32 = arith.constant 0 : i32
    %1 = arith.cmpi eq, %c16_i32, %c0_i32 : i32
    %c1_i32 = arith.constant 1 : i32
    %2 = arith.select %1, %c1_i32, %c16_i32 : i32
    %3 = vector.broadcast %2 : i32 to vector<16x1xi32>
    %4 = arith.remsi %0, %3 : vector<16x1xi32>
    %c0_i32_0 = arith.constant 0 : i32
    %5 = vector.broadcast %c0_i32_0 : i32 to vector<16x1xi32>
    %6 = arith.cmpi ne, %4, %5 : vector<16x1xi32>
    %c0_i32_1 = arith.constant 0 : i32
    %7 = vector.broadcast %c0_i32_1 : i32 to vector<16x1xi32>
    %8 = arith.cmpi slt, %4, %7 : vector<16x1xi32>
    %c0_i32_2 = arith.constant 0 : i32
    %9 = arith.cmpi slt, %2, %c0_i32_2 : i32
    %10 = vector.broadcast %9 : i1 to vector<16x1xi1>
    %11 = vector.broadcast %10 : vector<16x1xi1> to vector<16x1xi1>
    %12 = arith.xori %8, %11 : vector<16x1xi1>
    %13 = arith.andi %12, %6 : vector<16x1xi1>
    %14 = vector.broadcast %2 : i32 to vector<16x1xi32>
    %15 = arith.addi %4, %14 : vector<16x1xi32>
    %16 = arith.select %13, %15, %4 : vector<16x1xi1>, vector<16x1xi32>
    %c-1_i32 = arith.constant -1 : i32
    %17 = vector.broadcast %c-1_i32 : i32 to vector<16x1xi32>
    %18 = arith.addi %16, %17 : vector<16x1xi32>
    %c0_i32_3 = arith.constant 0 : i32
    %19 = vector.broadcast %c0_i32_3 : i32 to vector<16x1xi32>
    %20 = arith.cmpi sge, %18, %19 : vector<16x1xi32>
    %c16_i32_4 = arith.constant 16 : i32
    %21 = vector.broadcast %c16_i32_4 : i32 to vector<16x1xi32>
    %22 = arith.cmpi slt, %18, %21 : vector<16x1xi32>
    %23 = arith.andi %20, %22 : vector<16x1xi1>
    %24 = arith.extui %23 : vector<16x1xi1> to vector<16x1xi32>
    %25 = arith.sitofp %24 : vector<16x1xi32> to vector<16x1xf32>
    %c1_i32_5 = arith.constant 1 : i32
    %26 = vector.broadcast %c1_i32_5 : i32 to vector<16x1xi32>
    %27 = arith.addi %16, %26 : vector<16x1xi32>
    %c0_i32_6 = arith.constant 0 : i32
    %28 = vector.broadcast %c0_i32_6 : i32 to vector<16x1xi32>
    %29 = arith.cmpi sge, %27, %28 : vector<16x1xi32>
    %c16_i32_7 = arith.constant 16 : i32
    %30 = vector.broadcast %c16_i32_7 : i32 to vector<16x1xi32>
    %31 = arith.cmpi slt, %27, %30 : vector<16x1xi32>
    %32 = arith.andi %29, %31 : vector<16x1xi1>
    %33 = arith.extui %32 : vector<16x1xi1> to vector<16x1xi32>
    %34 = arith.sitofp %33 : vector<16x1xi32> to vector<16x1xf32>
    %c0 = arith.constant 0 : index
    %c0_8 = arith.constant 0 : index
    %35 = vector.load %arg1[%c0, %c0_8] : memref<16x4xf32, #tpu.memory_space<vmem>>, vector<16x4xf32>
    %c0_9 = arith.constant 0 : index
    %c0_10 = arith.constant 0 : index
    %36 = vector.load %arg3[%c0_9, %c0_10] : memref<1x32xf32, #tpu.memory_space<vmem>>, vector<1x32xf32>
    %37 = vector.extract_strided_slice %35 {offsets = [15, 0], sizes = [1, 4], strides = [1, 1]} : vector<16x4xf32> to vector<1x4xf32>
    %38 = vector.extract_strided_slice %35 {offsets = [0, 0], sizes = [15, 4], strides = [1, 1]} : vector<16x4xf32> to vector<15x4xf32>
    %39 = tpu.concatenate %37, %38 in 0 : vector<1x4xf32>, vector<15x4xf32> -> vector<16x4xf32>
    %40 = vector.broadcast %25 : vector<16x1xf32> to vector<16x4xf32>
    %41 = arith.mulf %39, %40 : vector<16x4xf32>
    %42 = arith.truncf %41 : vector<16x4xf32> to vector<16x4xbf16>
    %c0_11 = arith.constant 0 : index
    %c0_12 = arith.constant 0 : index
    %c0_13 = arith.constant 0 : index
    %43 = vector.load %arg2[%c0_11, %c0_12, %c0_13] : memref<3x4x32xbf16, #tpu.memory_space<vmem>>, vector<1x4x32xbf16>
    %44 = vector.shape_cast %43 : vector<1x4x32xbf16> to vector<4x32xbf16>
    %cst = arith.constant dense<0.000000e+00> : vector<16x32xf32>
    %45 = tpu.matmul %42, %44, %cst {dimension_numbers = #tpu.dot_dimension_numbers<[1], [0], [0], [1], [0, 0, 1, 1], [], []>} : vector<16x4xbf16>, vector<4x32xbf16>, vector<16x32xf32> -> vector<16x32xf32>
    %46 = arith.truncf %35 : vector<16x4xf32> to vector<16x4xbf16>
    %c1 = arith.constant 1 : index
    %c0_14 = arith.constant 0 : index
    %c0_15 = arith.constant 0 : index
    %47 = vector.load %arg2[%c1, %c0_14, %c0_15] : memref<3x4x32xbf16, #tpu.memory_space<vmem>>, vector<1x4x32xbf16>
    %48 = vector.shape_cast %47 : vector<1x4x32xbf16> to vector<4x32xbf16>
    %cst_16 = arith.constant dense<0.000000e+00> : vector<16x32xf32>
    %49 = tpu.matmul %46, %48, %cst_16 {dimension_numbers = #tpu.dot_dimension_numbers<[1], [0], [0], [1], [0, 0, 1, 1], [], []>} : vector<16x4xbf16>, vector<4x32xbf16>, vector<16x32xf32> -> vector<16x32xf32>
    %50 = arith.addf %45, %49 : vector<16x32xf32>
    %51 = vector.extract_strided_slice %35 {offsets = [1, 0], sizes = [15, 4], strides = [1, 1]} : vector<16x4xf32> to vector<15x4xf32>
    %52 = vector.extract_strided_slice %35 {offsets = [0, 0], sizes = [1, 4], strides = [1, 1]} : vector<16x4xf32> to vector<1x4xf32>
    %53 = tpu.concatenate %51, %52 in 0 : vector<15x4xf32>, vector<1x4xf32> -> vector<16x4xf32>
    %54 = vector.broadcast %34 : vector<16x1xf32> to vector<16x4xf32>
    %55 = arith.mulf %53, %54 : vector<16x4xf32>
    %56 = arith.truncf %55 : vector<16x4xf32> to vector<16x4xbf16>
    %c2 = arith.constant 2 : index
    %c0_17 = arith.constant 0 : index
    %c0_18 = arith.constant 0 : index
    %57 = vector.load %arg2[%c2, %c0_17, %c0_18] : memref<3x4x32xbf16, #tpu.memory_space<vmem>>, vector<1x4x32xbf16>
    %58 = vector.shape_cast %57 : vector<1x4x32xbf16> to vector<4x32xbf16>
    %cst_19 = arith.constant dense<0.000000e+00> : vector<16x32xf32>
    %59 = tpu.matmul %56, %58, %cst_19 {dimension_numbers = #tpu.dot_dimension_numbers<[1], [0], [0], [1], [0, 0, 1, 1], [], []>} : vector<16x4xbf16>, vector<4x32xbf16>, vector<16x32xf32> -> vector<16x32xf32>
    %60 = arith.addf %50, %59 : vector<16x32xf32>
    %61 = vector.broadcast %36 : vector<1x32xf32> to vector<16x32xf32>
    %62 = arith.addf %60, %61 : vector<16x32xf32>
    %c0_20 = arith.constant 0 : index
    %c0_21 = arith.constant 0 : index
    %c0_22 = arith.constant 0 : index
    %63 = vector.load %arg4[%c0_20, %c0_21, %c0_22] : memref<2x1x32xf32, #tpu.memory_space<vmem>>, vector<1x1x32xf32>
    %64 = vector.shape_cast %63 : vector<1x1x32xf32> to vector<1x32xf32>
    %65 = vector.broadcast %64 : vector<1x32xf32> to vector<16x32xf32>
    %66 = arith.mulf %62, %65 : vector<16x32xf32>
    %c0_23 = arith.constant 0 : index
    %c0_24 = arith.constant 0 : index
    %c0_25 = arith.constant 0 : index
    %67 = vector.load %arg5[%c0_23, %c0_24, %c0_25] : memref<2x1x32xf32, #tpu.memory_space<vmem>>, vector<1x1x32xf32>
    %68 = vector.shape_cast %67 : vector<1x1x32xf32> to vector<1x32xf32>
    %69 = vector.broadcast %68 : vector<1x32xf32> to vector<16x32xf32>
    %70 = arith.addf %66, %69 : vector<16x32xf32>
    %cst_26 = arith.constant 0.000000e+00 : f32
    %71 = vector.broadcast %cst_26 : f32 to vector<16x32xf32>
    %72 = arith.maximumf %70, %71 : vector<16x32xf32>
    %73 = vector.extract_strided_slice %72 {offsets = [15, 0], sizes = [1, 32], strides = [1, 1]} : vector<16x32xf32> to vector<1x32xf32>
    %74 = vector.extract_strided_slice %72 {offsets = [0, 0], sizes = [15, 32], strides = [1, 1]} : vector<16x32xf32> to vector<15x32xf32>
    %75 = tpu.concatenate %73, %74 in 0 : vector<1x32xf32>, vector<15x32xf32> -> vector<16x32xf32>
    %76 = vector.broadcast %25 : vector<16x1xf32> to vector<16x32xf32>
    %77 = arith.mulf %75, %76 : vector<16x32xf32>
    %78 = arith.truncf %77 : vector<16x32xf32> to vector<16x32xbf16>
    %c0_27 = arith.constant 0 : index
    %c0_28 = arith.constant 0 : index
    %c0_29 = arith.constant 0 : index
    %c0_30 = arith.constant 0 : index
    %79 = vector.load %arg6[%c0_27, %c0_28, %c0_29, %c0_30] : memref<2x3x32x32xbf16, #tpu.memory_space<vmem>>, vector<1x1x32x32xbf16>
    %80 = vector.shape_cast %79 : vector<1x1x32x32xbf16> to vector<32x32xbf16>
    %cst_31 = arith.constant dense<0.000000e+00> : vector<16x32xf32>
    %81 = tpu.matmul %78, %80, %cst_31 {dimension_numbers = #tpu.dot_dimension_numbers<[1], [0], [0], [1], [0, 0, 1, 1], [], []>} : vector<16x32xbf16>, vector<32x32xbf16>, vector<16x32xf32> -> vector<16x32xf32>
    %82 = arith.truncf %72 : vector<16x32xf32> to vector<16x32xbf16>
    %c0_32 = arith.constant 0 : index
    %c1_33 = arith.constant 1 : index
    %c0_34 = arith.constant 0 : index
    %c0_35 = arith.constant 0 : index
    %83 = vector.load %arg6[%c0_32, %c1_33, %c0_34, %c0_35] : memref<2x3x32x32xbf16, #tpu.memory_space<vmem>>, vector<1x1x32x32xbf16>
    %84 = vector.shape_cast %83 : vector<1x1x32x32xbf16> to vector<32x32xbf16>
    %cst_36 = arith.constant dense<0.000000e+00> : vector<16x32xf32>
    %85 = tpu.matmul %82, %84, %cst_36 {dimension_numbers = #tpu.dot_dimension_numbers<[1], [0], [0], [1], [0, 0, 1, 1], [], []>} : vector<16x32xbf16>, vector<32x32xbf16>, vector<16x32xf32> -> vector<16x32xf32>
    %86 = arith.addf %81, %85 : vector<16x32xf32>
    %87 = vector.extract_strided_slice %72 {offsets = [1, 0], sizes = [15, 32], strides = [1, 1]} : vector<16x32xf32> to vector<15x32xf32>
    %88 = vector.extract_strided_slice %72 {offsets = [0, 0], sizes = [1, 32], strides = [1, 1]} : vector<16x32xf32> to vector<1x32xf32>
    %89 = tpu.concatenate %87, %88 in 0 : vector<15x32xf32>, vector<1x32xf32> -> vector<16x32xf32>
    %90 = vector.broadcast %34 : vector<16x1xf32> to vector<16x32xf32>
    %91 = arith.mulf %89, %90 : vector<16x32xf32>
    %92 = arith.truncf %91 : vector<16x32xf32> to vector<16x32xbf16>
    %c0_37 = arith.constant 0 : index
    %c2_38 = arith.constant 2 : index
    %c0_39 = arith.constant 0 : index
    %c0_40 = arith.constant 0 : index
    %93 = vector.load %arg6[%c0_37, %c2_38, %c0_39, %c0_40] : memref<2x3x32x32xbf16, #tpu.memory_space<vmem>>, vector<1x1x32x32xbf16>
    %94 = vector.shape_cast %93 : vector<1x1x32x32xbf16> to vector<32x32xbf16>
    %cst_41 = arith.constant dense<0.000000e+00> : vector<16x32xf32>
    %95 = tpu.matmul %92, %94, %cst_41 {dimension_numbers = #tpu.dot_dimension_numbers<[1], [0], [0], [1], [0, 0, 1, 1], [], []>} : vector<16x32xbf16>, vector<32x32xbf16>, vector<16x32xf32> -> vector<16x32xf32>
    %96 = arith.addf %86, %95 : vector<16x32xf32>
    %c0_42 = arith.constant 0 : index
    %c0_43 = arith.constant 0 : index
    %c0_44 = arith.constant 0 : index
    %97 = vector.load %arg7[%c0_42, %c0_43, %c0_44] : memref<2x1x32xf32, #tpu.memory_space<vmem>>, vector<1x1x32xf32>
    %98 = vector.shape_cast %97 : vector<1x1x32xf32> to vector<1x32xf32>
    %99 = vector.broadcast %98 : vector<1x32xf32> to vector<16x32xf32>
    %100 = arith.mulf %96, %99 : vector<16x32xf32>
    %c0_45 = arith.constant 0 : index
    %c0_46 = arith.constant 0 : index
    %c0_47 = arith.constant 0 : index
    %101 = vector.load %arg8[%c0_45, %c0_46, %c0_47] : memref<2x1x32xf32, #tpu.memory_space<vmem>>, vector<1x1x32xf32>
    %102 = vector.shape_cast %101 : vector<1x1x32xf32> to vector<1x32xf32>
    %103 = vector.broadcast %102 : vector<1x32xf32> to vector<16x32xf32>
    %104 = arith.addf %100, %103 : vector<16x32xf32>
    %cst_48 = arith.constant 0.000000e+00 : f32
    %105 = vector.broadcast %cst_48 : f32 to vector<16x32xf32>
    %106 = arith.maximumf %104, %105 : vector<16x32xf32>
    %c0_49 = arith.constant 0 : index
    %c0_50 = arith.constant 0 : index
    %c0_51 = arith.constant 0 : index
    %107 = vector.load %arg10[%c0_49, %c0_50, %c0_51] : memref<2x1x32xf32, #tpu.memory_space<vmem>>, vector<1x1x32xf32>
    %108 = vector.shape_cast %107 : vector<1x1x32xf32> to vector<1x32xf32>
    %109 = vector.extract_strided_slice %106 {offsets = [15, 0], sizes = [1, 32], strides = [1, 1]} : vector<16x32xf32> to vector<1x32xf32>
    %110 = vector.extract_strided_slice %106 {offsets = [0, 0], sizes = [15, 32], strides = [1, 1]} : vector<16x32xf32> to vector<15x32xf32>
    %111 = tpu.concatenate %109, %110 in 0 : vector<1x32xf32>, vector<15x32xf32> -> vector<16x32xf32>
    %112 = vector.broadcast %25 : vector<16x1xf32> to vector<16x32xf32>
    %113 = arith.mulf %111, %112 : vector<16x32xf32>
    %114 = arith.truncf %113 : vector<16x32xf32> to vector<16x32xbf16>
    %c0_52 = arith.constant 0 : index
    %c0_53 = arith.constant 0 : index
    %c0_54 = arith.constant 0 : index
    %c0_55 = arith.constant 0 : index
    %115 = vector.load %arg9[%c0_52, %c0_53, %c0_54, %c0_55] : memref<2x3x32x32xbf16, #tpu.memory_space<vmem>>, vector<1x1x32x32xbf16>
    %116 = vector.shape_cast %115 : vector<1x1x32x32xbf16> to vector<32x32xbf16>
    %cst_56 = arith.constant dense<0.000000e+00> : vector<16x32xf32>
    %117 = tpu.matmul %114, %116, %cst_56 {dimension_numbers = #tpu.dot_dimension_numbers<[1], [0], [0], [1], [0, 0, 1, 1], [], []>} : vector<16x32xbf16>, vector<32x32xbf16>, vector<16x32xf32> -> vector<16x32xf32>
    %118 = arith.truncf %106 : vector<16x32xf32> to vector<16x32xbf16>
    %c0_57 = arith.constant 0 : index
    %c1_58 = arith.constant 1 : index
    %c0_59 = arith.constant 0 : index
    %c0_60 = arith.constant 0 : index
    %119 = vector.load %arg9[%c0_57, %c1_58, %c0_59, %c0_60] : memref<2x3x32x32xbf16, #tpu.memory_space<vmem>>, vector<1x1x32x32xbf16>
    %120 = vector.shape_cast %119 : vector<1x1x32x32xbf16> to vector<32x32xbf16>
    %cst_61 = arith.constant dense<0.000000e+00> : vector<16x32xf32>
    %121 = tpu.matmul %118, %120, %cst_61 {dimension_numbers = #tpu.dot_dimension_numbers<[1], [0], [0], [1], [0, 0, 1, 1], [], []>} : vector<16x32xbf16>, vector<32x32xbf16>, vector<16x32xf32> -> vector<16x32xf32>
    %122 = arith.addf %117, %121 : vector<16x32xf32>
    %123 = vector.extract_strided_slice %106 {offsets = [1, 0], sizes = [15, 32], strides = [1, 1]} : vector<16x32xf32> to vector<15x32xf32>
    %124 = vector.extract_strided_slice %106 {offsets = [0, 0], sizes = [1, 32], strides = [1, 1]} : vector<16x32xf32> to vector<1x32xf32>
    %125 = tpu.concatenate %123, %124 in 0 : vector<15x32xf32>, vector<1x32xf32> -> vector<16x32xf32>
    %126 = vector.broadcast %34 : vector<16x1xf32> to vector<16x32xf32>
    %127 = arith.mulf %125, %126 : vector<16x32xf32>
    %128 = arith.truncf %127 : vector<16x32xf32> to vector<16x32xbf16>
    %c0_62 = arith.constant 0 : index
    %c2_63 = arith.constant 2 : index
    %c0_64 = arith.constant 0 : index
    %c0_65 = arith.constant 0 : index
    %129 = vector.load %arg9[%c0_62, %c2_63, %c0_64, %c0_65] : memref<2x3x32x32xbf16, #tpu.memory_space<vmem>>, vector<1x1x32x32xbf16>
    %130 = vector.shape_cast %129 : vector<1x1x32x32xbf16> to vector<32x32xbf16>
    %cst_66 = arith.constant dense<0.000000e+00> : vector<16x32xf32>
    %131 = tpu.matmul %128, %130, %cst_66 {dimension_numbers = #tpu.dot_dimension_numbers<[1], [0], [0], [1], [0, 0, 1, 1], [], []>} : vector<16x32xbf16>, vector<32x32xbf16>, vector<16x32xf32> -> vector<16x32xf32>
    %132 = arith.addf %122, %131 : vector<16x32xf32>
    %133 = vector.broadcast %108 : vector<1x32xf32> to vector<16x32xf32>
    %134 = arith.addf %132, %133 : vector<16x32xf32>
    %135 = arith.addf %62, %134 : vector<16x32xf32>
    %c1_67 = arith.constant 1 : index
    %c0_68 = arith.constant 0 : index
    %c0_69 = arith.constant 0 : index
    %136 = vector.load %arg4[%c1_67, %c0_68, %c0_69] : memref<2x1x32xf32, #tpu.memory_space<vmem>>, vector<1x1x32xf32>
    %137 = vector.shape_cast %136 : vector<1x1x32xf32> to vector<1x32xf32>
    %138 = vector.broadcast %137 : vector<1x32xf32> to vector<16x32xf32>
    %139 = arith.mulf %135, %138 : vector<16x32xf32>
    %c1_70 = arith.constant 1 : index
    %c0_71 = arith.constant 0 : index
    %c0_72 = arith.constant 0 : index
    %140 = vector.load %arg5[%c1_70, %c0_71, %c0_72] : memref<2x1x32xf32, #tpu.memory_space<vmem>>, vector<1x1x32xf32>
    %141 = vector.shape_cast %140 : vector<1x1x32xf32> to vector<1x32xf32>
    %142 = vector.broadcast %141 : vector<1x32xf32> to vector<16x32xf32>
    %143 = arith.addf %139, %142 : vector<16x32xf32>
    %cst_73 = arith.constant 0.000000e+00 : f32
    %144 = vector.broadcast %cst_73 : f32 to vector<16x32xf32>
    %145 = arith.maximumf %143, %144 : vector<16x32xf32>
    %146 = vector.extract_strided_slice %145 {offsets = [15, 0], sizes = [1, 32], strides = [1, 1]} : vector<16x32xf32> to vector<1x32xf32>
    %147 = vector.extract_strided_slice %145 {offsets = [0, 0], sizes = [15, 32], strides = [1, 1]} : vector<16x32xf32> to vector<15x32xf32>
    %148 = tpu.concatenate %146, %147 in 0 : vector<1x32xf32>, vector<15x32xf32> -> vector<16x32xf32>
    %149 = vector.broadcast %25 : vector<16x1xf32> to vector<16x32xf32>
    %150 = arith.mulf %148, %149 : vector<16x32xf32>
    %151 = arith.truncf %150 : vector<16x32xf32> to vector<16x32xbf16>
    %c1_74 = arith.constant 1 : index
    %c0_75 = arith.constant 0 : index
    %c0_76 = arith.constant 0 : index
    %c0_77 = arith.constant 0 : index
    %152 = vector.load %arg6[%c1_74, %c0_75, %c0_76, %c0_77] : memref<2x3x32x32xbf16, #tpu.memory_space<vmem>>, vector<1x1x32x32xbf16>
    %153 = vector.shape_cast %152 : vector<1x1x32x32xbf16> to vector<32x32xbf16>
    %cst_78 = arith.constant dense<0.000000e+00> : vector<16x32xf32>
    %154 = tpu.matmul %151, %153, %cst_78 {dimension_numbers = #tpu.dot_dimension_numbers<[1], [0], [0], [1], [0, 0, 1, 1], [], []>} : vector<16x32xbf16>, vector<32x32xbf16>, vector<16x32xf32> -> vector<16x32xf32>
    %155 = arith.truncf %145 : vector<16x32xf32> to vector<16x32xbf16>
    %c1_79 = arith.constant 1 : index
    %c1_80 = arith.constant 1 : index
    %c0_81 = arith.constant 0 : index
    %c0_82 = arith.constant 0 : index
    %156 = vector.load %arg6[%c1_79, %c1_80, %c0_81, %c0_82] : memref<2x3x32x32xbf16, #tpu.memory_space<vmem>>, vector<1x1x32x32xbf16>
    %157 = vector.shape_cast %156 : vector<1x1x32x32xbf16> to vector<32x32xbf16>
    %cst_83 = arith.constant dense<0.000000e+00> : vector<16x32xf32>
    %158 = tpu.matmul %155, %157, %cst_83 {dimension_numbers = #tpu.dot_dimension_numbers<[1], [0], [0], [1], [0, 0, 1, 1], [], []>} : vector<16x32xbf16>, vector<32x32xbf16>, vector<16x32xf32> -> vector<16x32xf32>
    %159 = arith.addf %154, %158 : vector<16x32xf32>
    %160 = vector.extract_strided_slice %145 {offsets = [1, 0], sizes = [15, 32], strides = [1, 1]} : vector<16x32xf32> to vector<15x32xf32>
    %161 = vector.extract_strided_slice %145 {offsets = [0, 0], sizes = [1, 32], strides = [1, 1]} : vector<16x32xf32> to vector<1x32xf32>
    %162 = tpu.concatenate %160, %161 in 0 : vector<15x32xf32>, vector<1x32xf32> -> vector<16x32xf32>
    %163 = vector.broadcast %34 : vector<16x1xf32> to vector<16x32xf32>
    %164 = arith.mulf %162, %163 : vector<16x32xf32>
    %165 = arith.truncf %164 : vector<16x32xf32> to vector<16x32xbf16>
    %c1_84 = arith.constant 1 : index
    %c2_85 = arith.constant 2 : index
    %c0_86 = arith.constant 0 : index
    %c0_87 = arith.constant 0 : index
    %166 = vector.load %arg6[%c1_84, %c2_85, %c0_86, %c0_87] : memref<2x3x32x32xbf16, #tpu.memory_space<vmem>>, vector<1x1x32x32xbf16>
    %167 = vector.shape_cast %166 : vector<1x1x32x32xbf16> to vector<32x32xbf16>
    %cst_88 = arith.constant dense<0.000000e+00> : vector<16x32xf32>
    %168 = tpu.matmul %165, %167, %cst_88 {dimension_numbers = #tpu.dot_dimension_numbers<[1], [0], [0], [1], [0, 0, 1, 1], [], []>} : vector<16x32xbf16>, vector<32x32xbf16>, vector<16x32xf32> -> vector<16x32xf32>
    %169 = arith.addf %159, %168 : vector<16x32xf32>
    %c1_89 = arith.constant 1 : index
    %c0_90 = arith.constant 0 : index
    %c0_91 = arith.constant 0 : index
    %170 = vector.load %arg7[%c1_89, %c0_90, %c0_91] : memref<2x1x32xf32, #tpu.memory_space<vmem>>, vector<1x1x32xf32>
    %171 = vector.shape_cast %170 : vector<1x1x32xf32> to vector<1x32xf32>
    %172 = vector.broadcast %171 : vector<1x32xf32> to vector<16x32xf32>
    %173 = arith.mulf %169, %172 : vector<16x32xf32>
    %c1_92 = arith.constant 1 : index
    %c0_93 = arith.constant 0 : index
    %c0_94 = arith.constant 0 : index
    %174 = vector.load %arg8[%c1_92, %c0_93, %c0_94] : memref<2x1x32xf32, #tpu.memory_space<vmem>>, vector<1x1x32xf32>
    %175 = vector.shape_cast %174 : vector<1x1x32xf32> to vector<1x32xf32>
    %176 = vector.broadcast %175 : vector<1x32xf32> to vector<16x32xf32>
    %177 = arith.addf %173, %176 : vector<16x32xf32>
    %cst_95 = arith.constant 0.000000e+00 : f32
    %178 = vector.broadcast %cst_95 : f32 to vector<16x32xf32>
    %179 = arith.maximumf %177, %178 : vector<16x32xf32>
    %c1_96 = arith.constant 1 : index
    %c0_97 = arith.constant 0 : index
    %c0_98 = arith.constant 0 : index
    %180 = vector.load %arg10[%c1_96, %c0_97, %c0_98] : memref<2x1x32xf32, #tpu.memory_space<vmem>>, vector<1x1x32xf32>
    %181 = vector.shape_cast %180 : vector<1x1x32xf32> to vector<1x32xf32>
    %182 = vector.extract_strided_slice %179 {offsets = [15, 0], sizes = [1, 32], strides = [1, 1]} : vector<16x32xf32> to vector<1x32xf32>
    %183 = vector.extract_strided_slice %179 {offsets = [0, 0], sizes = [15, 32], strides = [1, 1]} : vector<16x32xf32> to vector<15x32xf32>
    %184 = tpu.concatenate %182, %183 in 0 : vector<1x32xf32>, vector<15x32xf32> -> vector<16x32xf32>
    %185 = vector.broadcast %25 : vector<16x1xf32> to vector<16x32xf32>
    %186 = arith.mulf %184, %185 : vector<16x32xf32>
    %187 = arith.truncf %186 : vector<16x32xf32> to vector<16x32xbf16>
    %c1_99 = arith.constant 1 : index
    %c0_100 = arith.constant 0 : index
    %c0_101 = arith.constant 0 : index
    %c0_102 = arith.constant 0 : index
    %188 = vector.load %arg9[%c1_99, %c0_100, %c0_101, %c0_102] : memref<2x3x32x32xbf16, #tpu.memory_space<vmem>>, vector<1x1x32x32xbf16>
    %189 = vector.shape_cast %188 : vector<1x1x32x32xbf16> to vector<32x32xbf16>
    %cst_103 = arith.constant dense<0.000000e+00> : vector<16x32xf32>
    %190 = tpu.matmul %187, %189, %cst_103 {dimension_numbers = #tpu.dot_dimension_numbers<[1], [0], [0], [1], [0, 0, 1, 1], [], []>} : vector<16x32xbf16>, vector<32x32xbf16>, vector<16x32xf32> -> vector<16x32xf32>
    %191 = arith.truncf %179 : vector<16x32xf32> to vector<16x32xbf16>
    %c1_104 = arith.constant 1 : index
    %c1_105 = arith.constant 1 : index
    %c0_106 = arith.constant 0 : index
    %c0_107 = arith.constant 0 : index
    %192 = vector.load %arg9[%c1_104, %c1_105, %c0_106, %c0_107] : memref<2x3x32x32xbf16, #tpu.memory_space<vmem>>, vector<1x1x32x32xbf16>
    %193 = vector.shape_cast %192 : vector<1x1x32x32xbf16> to vector<32x32xbf16>
    %cst_108 = arith.constant dense<0.000000e+00> : vector<16x32xf32>
    %194 = tpu.matmul %191, %193, %cst_108 {dimension_numbers = #tpu.dot_dimension_numbers<[1], [0], [0], [1], [0, 0, 1, 1], [], []>} : vector<16x32xbf16>, vector<32x32xbf16>, vector<16x32xf32> -> vector<16x32xf32>
    %195 = arith.addf %190, %194 : vector<16x32xf32>
    %196 = vector.extract_strided_slice %179 {offsets = [1, 0], sizes = [15, 32], strides = [1, 1]} : vector<16x32xf32> to vector<15x32xf32>
    %197 = vector.extract_strided_slice %179 {offsets = [0, 0], sizes = [1, 32], strides = [1, 1]} : vector<16x32xf32> to vector<1x32xf32>
    %198 = tpu.concatenate %196, %197 in 0 : vector<15x32xf32>, vector<1x32xf32> -> vector<16x32xf32>
    %199 = vector.broadcast %34 : vector<16x1xf32> to vector<16x32xf32>
    %200 = arith.mulf %198, %199 : vector<16x32xf32>
    %201 = arith.truncf %200 : vector<16x32xf32> to vector<16x32xbf16>
    %c1_109 = arith.constant 1 : index
    %c2_110 = arith.constant 2 : index
    %c0_111 = arith.constant 0 : index
    %c0_112 = arith.constant 0 : index
    %202 = vector.load %arg9[%c1_109, %c2_110, %c0_111, %c0_112] : memref<2x3x32x32xbf16, #tpu.memory_space<vmem>>, vector<1x1x32x32xbf16>
    %203 = vector.shape_cast %202 : vector<1x1x32x32xbf16> to vector<32x32xbf16>
    %cst_113 = arith.constant dense<0.000000e+00> : vector<16x32xf32>
    %204 = tpu.matmul %201, %203, %cst_113 {dimension_numbers = #tpu.dot_dimension_numbers<[1], [0], [0], [1], [0, 0, 1, 1], [], []>} : vector<16x32xbf16>, vector<32x32xbf16>, vector<16x32xf32> -> vector<16x32xf32>
    %205 = arith.addf %195, %204 : vector<16x32xf32>
    %206 = vector.broadcast %181 : vector<1x32xf32> to vector<16x32xf32>
    %207 = arith.addf %205, %206 : vector<16x32xf32>
    %208 = arith.addf %135, %207 : vector<16x32xf32>
    %c0_114 = arith.constant 0 : index
    %c0_115 = arith.constant 0 : index
    %209 = vector.load %arg12[%c0_114, %c0_115] : memref<1x4xf32, #tpu.memory_space<vmem>>, vector<1x4xf32>
    %210 = vector.extract_strided_slice %208 {offsets = [15, 0], sizes = [1, 32], strides = [1, 1]} : vector<16x32xf32> to vector<1x32xf32>
    %211 = vector.extract_strided_slice %208 {offsets = [0, 0], sizes = [15, 32], strides = [1, 1]} : vector<16x32xf32> to vector<15x32xf32>
    %212 = tpu.concatenate %210, %211 in 0 : vector<1x32xf32>, vector<15x32xf32> -> vector<16x32xf32>
    %213 = vector.broadcast %25 : vector<16x1xf32> to vector<16x32xf32>
    %214 = arith.mulf %212, %213 : vector<16x32xf32>
    %215 = arith.truncf %214 : vector<16x32xf32> to vector<16x32xbf16>
    %c0_116 = arith.constant 0 : index
    %c0_117 = arith.constant 0 : index
    %c0_118 = arith.constant 0 : index
    %216 = vector.load %arg11[%c0_116, %c0_117, %c0_118] : memref<3x32x4xbf16, #tpu.memory_space<vmem>>, vector<1x32x4xbf16>
    %217 = vector.shape_cast %216 : vector<1x32x4xbf16> to vector<32x4xbf16>
    %cst_119 = arith.constant dense<0.000000e+00> : vector<16x4xf32>
    %218 = tpu.matmul %215, %217, %cst_119 {dimension_numbers = #tpu.dot_dimension_numbers<[1], [0], [0], [1], [0, 0, 1, 1], [], []>} : vector<16x32xbf16>, vector<32x4xbf16>, vector<16x4xf32> -> vector<16x4xf32>
    %219 = arith.truncf %208 : vector<16x32xf32> to vector<16x32xbf16>
    %c1_120 = arith.constant 1 : index
    %c0_121 = arith.constant 0 : index
    %c0_122 = arith.constant 0 : index
    %220 = vector.load %arg11[%c1_120, %c0_121, %c0_122] : memref<3x32x4xbf16, #tpu.memory_space<vmem>>, vector<1x32x4xbf16>
    %221 = vector.shape_cast %220 : vector<1x32x4xbf16> to vector<32x4xbf16>
    %cst_123 = arith.constant dense<0.000000e+00> : vector<16x4xf32>
    %222 = tpu.matmul %219, %221, %cst_123 {dimension_numbers = #tpu.dot_dimension_numbers<[1], [0], [0], [1], [0, 0, 1, 1], [], []>} : vector<16x32xbf16>, vector<32x4xbf16>, vector<16x4xf32> -> vector<16x4xf32>
    %223 = arith.addf %218, %222 : vector<16x4xf32>
    %224 = vector.extract_strided_slice %208 {offsets = [1, 0], sizes = [15, 32], strides = [1, 1]} : vector<16x32xf32> to vector<15x32xf32>
    %225 = vector.extract_strided_slice %208 {offsets = [0, 0], sizes = [1, 32], strides = [1, 1]} : vector<16x32xf32> to vector<1x32xf32>
    %226 = tpu.concatenate %224, %225 in 0 : vector<15x32xf32>, vector<1x32xf32> -> vector<16x32xf32>
    %227 = vector.broadcast %34 : vector<16x1xf32> to vector<16x32xf32>
    %228 = arith.mulf %226, %227 : vector<16x32xf32>
    %229 = arith.truncf %228 : vector<16x32xf32> to vector<16x32xbf16>
    %c2_124 = arith.constant 2 : index
    %c0_125 = arith.constant 0 : index
    %c0_126 = arith.constant 0 : index
    %230 = vector.load %arg11[%c2_124, %c0_125, %c0_126] : memref<3x32x4xbf16, #tpu.memory_space<vmem>>, vector<1x32x4xbf16>
    %231 = vector.shape_cast %230 : vector<1x32x4xbf16> to vector<32x4xbf16>
    %cst_127 = arith.constant dense<0.000000e+00> : vector<16x4xf32>
    %232 = tpu.matmul %229, %231, %cst_127 {dimension_numbers = #tpu.dot_dimension_numbers<[1], [0], [0], [1], [0, 0, 1, 1], [], []>} : vector<16x32xbf16>, vector<32x4xbf16>, vector<16x4xf32> -> vector<16x4xf32>
    %233 = arith.addf %223, %232 : vector<16x4xf32>
    %234 = vector.broadcast %209 : vector<1x4xf32> to vector<16x4xf32>
    %235 = arith.addf %233, %234 : vector<16x4xf32>
    %c0_128 = arith.constant 0 : index
    %c0_129 = arith.constant 0 : index
    %236 = vector.load %arg13[%c0_128, %c0_129] : memref<16x4xf32, #tpu.memory_space<vmem>>, vector<16x4xf32>
    tpu.vector_store %arg13[%c0_128, %c0_129], %235 {strides = array<i32>} : memref<16x4xf32, #tpu.memory_space<vmem>>, vector<16x4xf32>,
    return
  }
  func.func @transform_0(%arg0: i32) -> (i32, i32) {
    %c0_i32 = arith.constant 0 : i32
    %c0_i32_0 = arith.constant 0 : i32
    return %arg0, %c0_i32 : i32, i32
  }
  func.func @transform_1(%arg0: i32) -> (i32, i32, i32) {
    %c0_i32 = arith.constant 0 : i32
    %c0_i32_0 = arith.constant 0 : i32
    %c0_i32_1 = arith.constant 0 : i32
    %c0_i32_2 = arith.constant 0 : i32
    return %c0_i32, %c0_i32_0, %c0_i32_1 : i32, i32, i32
  }
  func.func @transform_2(%arg0: i32) -> (i32, i32) {
    %c0_i32 = arith.constant 0 : i32
    %c0_i32_0 = arith.constant 0 : i32
    %c0_i32_1 = arith.constant 0 : i32
    return %c0_i32, %c0_i32_0 : i32, i32
  }
  func.func @transform_3(%arg0: i32) -> (i32, i32, i32) {
    %c0_i32 = arith.constant 0 : i32
    %c0_i32_0 = arith.constant 0 : i32
    %c0_i32_1 = arith.constant 0 : i32
    %c0_i32_2 = arith.constant 0 : i32
    return %c0_i32, %c0_i32_0, %c0_i32_1 : i32, i32, i32
  }
  func.func @transform_4(%arg0: i32) -> (i32, i32, i32) {
    %c0_i32 = arith.constant 0 : i32
    %c0_i32_0 = arith.constant 0 : i32
    %c0_i32_1 = arith.constant 0 : i32
    %c0_i32_2 = arith.constant 0 : i32
    return %c0_i32, %c0_i32_0, %c0_i32_1 : i32, i32, i32
  }
  func.func @transform_5(%arg0: i32) -> (i32, i32, i32, i32) {
    %c0_i32 = arith.constant 0 : i32
    %c0_i32_0 = arith.constant 0 : i32
    %c0_i32_1 = arith.constant 0 : i32
    %c0_i32_2 = arith.constant 0 : i32
    %c0_i32_3 = arith.constant 0 : i32
    return %c0_i32, %c0_i32_0, %c0_i32_1, %c0_i32_2 : i32, i32, i32, i32
  }
  func.func @transform_6(%arg0: i32) -> (i32, i32, i32) {
    %c0_i32 = arith.constant 0 : i32
    %c0_i32_0 = arith.constant 0 : i32
    %c0_i32_1 = arith.constant 0 : i32
    %c0_i32_2 = arith.constant 0 : i32
    return %c0_i32, %c0_i32_0, %c0_i32_1 : i32, i32, i32
  }
  func.func @transform_7(%arg0: i32) -> (i32, i32, i32) {
    %c0_i32 = arith.constant 0 : i32
    %c0_i32_0 = arith.constant 0 : i32
    %c0_i32_1 = arith.constant 0 : i32
    %c0_i32_2 = arith.constant 0 : i32
    return %c0_i32, %c0_i32_0, %c0_i32_1 : i32, i32, i32
  }
  func.func @transform_8(%arg0: i32) -> (i32, i32, i32, i32) {
    %c0_i32 = arith.constant 0 : i32
    %c0_i32_0 = arith.constant 0 : i32
    %c0_i32_1 = arith.constant 0 : i32
    %c0_i32_2 = arith.constant 0 : i32
    %c0_i32_3 = arith.constant 0 : i32
    return %c0_i32, %c0_i32_0, %c0_i32_1, %c0_i32_2 : i32, i32, i32, i32
  }
  func.func @transform_9(%arg0: i32) -> (i32, i32, i32) {
    %c0_i32 = arith.constant 0 : i32
    %c0_i32_0 = arith.constant 0 : i32
    %c0_i32_1 = arith.constant 0 : i32
    %c0_i32_2 = arith.constant 0 : i32
    return %c0_i32, %c0_i32_0, %c0_i32_1 : i32, i32, i32
  }
  func.func @transform_10(%arg0: i32) -> (i32, i32, i32) {
    %c0_i32 = arith.constant 0 : i32
    %c0_i32_0 = arith.constant 0 : i32
    %c0_i32_1 = arith.constant 0 : i32
    %c0_i32_2 = arith.constant 0 : i32
    return %c0_i32, %c0_i32_0, %c0_i32_1 : i32, i32, i32
  }
  func.func @transform_11(%arg0: i32) -> (i32, i32) {
    %c0_i32 = arith.constant 0 : i32
    %c0_i32_0 = arith.constant 0 : i32
    %c0_i32_1 = arith.constant 0 : i32
    return %c0_i32, %c0_i32_0 : i32, i32
  }
  func.func @transform_12(%arg0: i32) -> (i32, i32) {
    %c0_i32 = arith.constant 0 : i32
    %c0_i32_0 = arith.constant 0 : i32
    return %arg0, %c0_i32 : i32, i32
  }
}

</mosaic_0001>

<bundles_post_ra>
// kernel: tpu_custom_call.1
= control target key start
LH: loop header
LB: loop body
LE: loop exit
PB: predicated region body
PF: predicated region fallthrough
CT: control target
= control target key end

     0   :  { %17 = vsyncpa [#allocation3], 0  ;;  %s3103_s0 = inlined_call_operand.vmem [shape: f32[32,4], index: 0, kind: input, shape index: {}]   ;;  %s3104_s1 = inlined_call_operand.hbm [shape: bf16[3,4,32], index: 1, kind: input, shape index: {}]   ;;  %s3105_s2 = inlined_call_operand.hbm [shape: f32[1,32], index: 2, kind: input, shape index: {}]   ;;  %s3106_s3 = inlined_call_operand.hbm [shape: f32[2,1,32], index: 3, kind: input, shape index: {}]   ;;  %s3107_s4 = inlined_call_operand.hbm [shape: f32[2,1,32], index: 4, kind: input, shape index: {}]   ;;  %s3108_s5 = inlined_call_operand.vmem [shape: bf16[2,3,32,32], index: 5, kind: input, shape index: {}]   ;;  %s3109_s6 = inlined_call_operand.hbm [shape: f32[2,1,32], index: 6, kind: input, shape index: {}]   ;;  %s3110_s7 = inlined_call_operand.hbm [shape: f32[2,1,32], index: 7, kind: input, shape index: {}]   ;;  %s3111_s8 = inlined_call_operand.hbm [shape: bf16[2,3,32,32], index: 8, kind: input, shape index: {}]   ;;  %s3112_s9 = inlined_call_operand.vmem [shape: f32[2,1,32], index: 9, kind: input, shape index: {}]   ;;  %s3113_s10 = inlined_call_operand.vmem [shape: bf16[3,32,4], index: 10, kind: input, shape index: {}]   ;;  %s3114_s11 = inlined_call_operand.vmem [shape: f32[1,4], index: 11, kind: input, shape index: {}]   ;;  %s3115_s12 = inlined_call_operand.vmem [shape: f32[32,4], index: 12, kind: output, shape index: {}]  }
   0x1   :  { %18 = vsyncpa [#allocation5], 0 }
   0x2   :  { %19 = vsyncpa [#allocation8], 0 }
   0x3   :  { %20 = vsyncpa [#allocation11], 0  ;;  %s2744_s21 = smov 0  }
   0x4 LB: > { %s2664_s22 = smov [#allocation4]   ;;  %s3116_s24 = sadd.s32 4294967295, %s2662_s21   ;;  %s2662_s21 = sphi %s2744_s21, %s26_s21  }
   0x5   : > { %s340_s23 = sshll.u32 %s2664_s22, 4  ;;  %p2038_p0 = scmp.ge.s32.totalorder %s2662_s21, 1  ;;  %s341_s23 = int_to_ptr.vmem [resolvable:$true] %s340_s23 }
   0x6   : > { %p314_p1 = scmp.lt.s32.totalorder %s2662_s21, 3  ;;  %p2754_p2 = scmp.eq.s32.totalorder %s3116_s24, 0 }
   0x7   : > { %s2665_s27 = smov [#allocation7]   ;;  %s2666_s30 = smov [#allocation10]  }
   0x8   : > { %p2758_p3 = pnand %p2038_p0, %p314_p1  ;;  %s363_s28 = sshll.u32 %s2665_s27, 4  ;;  %s2764_s28 = int_to_ptr.vmem [resolvable:$true] %s363_s28 }
   0x9   : > { %s392_s13 = sshll.u32 %s2666_s30, 4  ;;  %s2667_s14 = smov [#allocation2]   ;;  %s2772_s13 = int_to_ptr.vmem [resolvable:$true] %s392_s13 }
   0xa   : > { %p2369_p4 = pneg %p2758_p3  ;;  %s2774_s15 = sshll.u32 %s2667_s14, 4  ;;  %s327_s15 = int_to_ptr.vmem [resolvable:$true] %s2774_s15 }
   0xb   : > { %s2469_s17 = scalar_lea.vmem %s341_s23, 16  ;;  %s2476_s18 = scalar_lea.vmem %s341_s23, 32 }
   0xc   : > { %p2768_p5 = pnand %p2754_p2, %p2369_p4  ;;  %p2470_p7 = scmp.ne.s32.totalorder %s341_s23, %s2469_s17 }
   0xd   : > { %p2477_p10 = scmp.lt.s32.totalorder %s341_s23, %s341_s23  ;;  %p2478_p11 = scmp.lt.s32.totalorder %s2476_s18, %s2469_s17 }
   0xe   : > { %p2778_p6 = pneg %p2768_p5 }
   0xf   : > { %p2479_p12 = por %p2478_p11, %p2477_p10 }
  0x10   : > { %p2472_p8 = pnand %p2470_p7, %p2778_p6 }
  0x12   : > { %p2473_p9 = pneg %p2472_p8 }
  0x14   : > { %p2480_p13 = pnand %p2479_p12, %p2473_p9 }
  0x16   : > { %2483 = shalt.err (!%p2480_p13)
}
  0x17   : > { %2375 = dma.hbm_to_vmem [thread:$0]  (!%p2768_p5), %s3105_s2, 16, %s341_s23, [#allocation5]  }
  0x18   : > { %s2495_s22 = scalar_lea.vmem %s2764_s28, 32  ;;  %p2503_p7 = scmp.lt.s32.totalorder %s2764_s28, %s2764_s28 }
  0x19   : > { %p2496_p0 = scmp.ne.s32.totalorder %s2764_s28, %s2495_s22  ;;  %p2504_p8 = scmp.lt.s32.totalorder %s2495_s22, %s2495_s22 }
  0x1b   : > { %p2498_p1 = pnand %p2496_p0, %p2778_p6  ;;  %p2505_p9 = por %p2504_p8, %p2503_p7 }
  0x1d   : > { %p2499_p4 = pneg %p2498_p1 }
  0x1f   : > { %p2506_p10 = pnand %p2505_p9, %p2499_p4 }
  0x21   : > { %2509 = shalt.err (!%p2506_p10)
}
  0x22   : > { %s2668_s27 = smov 16   ;;  %s2669_s30 = smov 1  }
  0x23   : > { %2381 = dma.hbm_to_vmem [thread:$0]  (!%p2768_p5), %s3107_s4, 32, %s2764_s28, [#allocation8], %s2668_s27, %s2668_s27, %s2669_s30  }
  0x24   : > { %s2521_s17 = scalar_lea.vmem %s2772_s13, 32  ;;  %p2529_p0 = scmp.lt.s32.totalorder %s2772_s13, %s2772_s13 }
  0x25   : > { %p2522_p11 = scmp.ne.s32.totalorder %s2772_s13, %s2521_s17  ;;  %p2530_p1 = scmp.lt.s32.totalorder %s2521_s17, %s2521_s17 }
  0x27   : > { %p2524_p12 = pnand %p2522_p11, %p2778_p6  ;;  %p2531_p4 = por %p2530_p1, %p2529_p0 }
  0x29   : > { %p2525_p13 = pneg %p2524_p12 }
  0x2b   : > { %p2532_p7 = pnand %p2531_p4, %p2525_p13 }
  0x2d   : > { %2535 = shalt.err (!%p2532_p7)
}
  0x2e   : > { %2387 = dma.hbm_to_vmem [thread:$0]  (!%p2768_p5), %s3110_s7, 32, %s2772_s13, [#allocation11], %s2668_s27, %s2668_s27, %s2669_s30  }
  0x2f   : > { %s2547_s28 = scalar_lea.vmem %s327_s15, 96  ;;  %p2555_p11 = scmp.lt.s32.totalorder %s327_s15, %s327_s15 }
  0x30   : > { %p2548_p8 = scmp.ne.s32.totalorder %s327_s15, %s2547_s28  ;;  %p2556_p12 = scmp.lt.s32.totalorder %s2547_s28, %s2547_s28 }
  0x32   : > { %p2550_p9 = pnand %p2548_p8, %p2778_p6  ;;  %p2557_p13 = por %p2556_p12, %p2555_p11 }
  0x34   : > { %p2551_p10 = pneg %p2550_p9 }
  0x36   : > { %p2558_p0 = pnand %p2557_p13, %p2551_p10 }
  0x38   : > { %2561 = shalt.err (!%p2558_p0)
}
  0x39   : > { %s2670_s20 = smov 32   ;;  %s2671_s22 = smov 2  }
  0x3a   : > { %2372 = dma.hbm_to_vmem [thread:$0]  (!%p2768_p5), %s3104_s1, 96, %s327_s15, [#allocation3], %s2670_s20, %s2670_s20, %s2671_s22  }
  0x3b   : > { %s2672_s13 = smov [#allocation6]   ;;  %s2673_s18 = smov [#allocation9]  }
  0x3c   : > { %s350_s17 = sshll.u32 %s2672_s13, 4  ;;  %s379_s19 = sshll.u32 %s2673_s18, 4  ;;  %s351_s17 = int_to_ptr.vmem [resolvable:$true] %s350_s17  ;;  %s380_s19 = int_to_ptr.vmem [resolvable:$true] %s379_s19 }
  0x3d   : > { %s2573_s24 = scalar_lea.vmem %s351_s17, 32  ;;  %p2581_p8 = scmp.lt.s32.totalorder %s351_s17, %s351_s17 }
  0x3e   : > { %p2574_p1 = scmp.ne.s32.totalorder %s351_s17, %s2573_s24  ;;  %p2582_p9 = scmp.lt.s32.totalorder %s2573_s24, %s2573_s24 }
  0x40   : > { %p2576_p4 = pnand %p2574_p1, %p2778_p6  ;;  %p2583_p10 = por %p2582_p9, %p2581_p8 }
  0x42   : > { %p2577_p7 = pneg %p2576_p4 }
  0x44   : > { %p2584_p11 = pnand %p2583_p10, %p2577_p7 }
  0x46   : > { %2587 = shalt.err (!%p2584_p11)
}
  0x47   : > { %2378 = dma.hbm_to_vmem [thread:$0]  (!%p2768_p5), %s3106_s3, 32, %s351_s17, [#allocation5], %s2668_s27, %s2668_s27, %s2669_s30  }
  0x48   : > { %s2599_s20 = scalar_lea.vmem %s380_s19, 32  ;;  %p2607_p1 = scmp.lt.s32.totalorder %s380_s19, %s380_s19 }
  0x49   : > { %p2600_p12 = scmp.ne.s32.totalorder %s380_s19, %s2599_s20  ;;  %p2608_p4 = scmp.lt.s32.totalorder %s2599_s20, %s2599_s20 }
  0x4b   : > { %p2602_p13 = pnand %p2600_p12, %p2778_p6  ;;  %p2609_p7 = por %p2608_p4, %p2607_p1 }
  0x4d   : > { %p2603_p0 = pneg %p2602_p13 }
  0x4f   : > { %p2610_p8 = pnand %p2609_p7, %p2603_p0 }
  0x51   : > { %2613 = shalt.err (!%p2610_p8)
}
  0x52   : > { %2384 = dma.hbm_to_vmem [thread:$0]  (!%p2768_p5), %s3109_s6, 32, %s380_s19, [#allocation8], %s2668_s27, %s2668_s27, %s2669_s30  }
  0x53   : > { %s2674_s23 = smov [#allocation12]  }
  0x54   : > { %s405_s14 = sshll.u32 %s2674_s23, 4  ;;  %s406_s14 = int_to_ptr.vmem [resolvable:$true] %s405_s14 }
  0x55   : > { %s2625_s13 = scalar_lea.vmem %s406_s14, 1536  ;;  %p2633_p12 = scmp.lt.s32.totalorder %s406_s14, %s406_s14 }
  0x56   : > { %p2626_p9 = scmp.ne.s32.totalorder %s406_s14, %s2625_s13  ;;  %p2634_p13 = scmp.lt.s32.totalorder %s2625_s13, %s2625_s13 }
  0x58   : > { %p2628_p10 = pnand %p2626_p9, %p2778_p6  ;;  %p2635_p0 = por %p2634_p13, %p2633_p12 }
  0x5a   : > { %p2629_p11 = pneg %p2628_p10 }
  0x5c   : > { %p2636_p1 = pnand %p2635_p0, %p2629_p11 }
  0x5e   : > { %2639 = shalt.err (!%p2636_p1)
}
  0x5f   : > { %s2675_s17 = smov 64   ;;  %s2676_s18 = smov 4  }
  0x60   : > { %2390 = dma.hbm_to_vmem [thread:$0]  (!%p2768_p5), %s3111_s8, 1536, %s406_s14, [#allocation11], %s2675_s17, %s2675_s17, %s2676_s18  }
  0x61   : > { %439 = sbr.rel (%p2758_p3) target bundleno = 1408 (0x580), region = 68 }
  0x66   : > { %2645 = dma.done.wait (%p2754_p2), [#allocation3], 96  }
  0x67   : > { %2647 = vsyncadd (%p2754_p2), [#allocation3], 4294967200 }
  0x68   : > { %2649 = dma.done.wait (%p2754_p2), [#allocation5], 48  }
  0x69   : > { %2651 = vsyncadd (%p2754_p2), [#allocation5], 4294967248 }
  0x6a   : > { %2653 = dma.done.wait (%p2754_p2), [#allocation8], 64  }
  0x6b   : > { %2655 = vsyncadd (%p2754_p2), [#allocation8], 4294967232 }
  0x6c   : > { %2657 = dma.done.wait (%p2754_p2), [#allocation11], 1568  }
  0x6d   : > { %2659 = vsyncadd (%p2754_p2), [#allocation11], 4294965728  ;;  %s3121_s26 = sadd.s32 4294967295, %s2662_s21   ;;  %v518_v0 = vlaneseq  ;;  %v2677_v1 = vmov 0.0   ;;  %vm2678_vm0 = vmmov 0   ;;  %vm593_vm1 = vcmask 1041408  }
  0x6e   : > { %s2055_s29 = sshll.u32 %s3121_s26, 1  ;;  %2203 = vmatprep.subr.bf16.mxu0 %v2677_v1  ;;  %2205 = vmatprep.mubr.msk.bf16.mxu0 %vm2678_vm0, %v2677_v1  ;;  %vm589_vm2 = vcmask 31744   ;;  %vm576_vm3 = vcmask 1040384   ;;  %v588_v6 = vld [vmem:[#allocation2 + $0x2] sm:$0x3]  ;;  %vm685_vm4 = vcmask 1046528  }
  0x6f   : > { %p506_p3 = scmp.lt.s32.totalorder %s2055_s29, 3  ;;  %2209 = vmatprep.subr.bf16.mxu1 %v2677_v1  ;;  %2211 = vmatprep.mubr.msk.bf16.mxu1 %vm2678_vm0, %v2677_v1  ;;  %v519_v2 = vshrl.u32 %v518_v0, 7  ;;  %v595_v10 = vsel %vm593_vm1, %v588_v6, 0  ;;  %v585_v14 = vld [vmem:[#allocation2] sm:$0x3]  ;;  %v2428_v31 = vld [vmem:[%s3108_s5 + $0x18] sm:$0xff]  }
  0x70   : > { %2204 = vmatpush3.bf16.msra.mxu0 %v595_v10  ;;  %v642_v17 = vsel %vm593_vm1, %v585_v14, 0  ;;  %v697_v18 = vld [vmem:[#allocation2 + $0x4] sm:$0x3]  ;;  %v2429_v32 = vld [vmem:[%s3108_s5 + $0x10] sm:$0xff]   ;;  %v2432_v34 = vld [vmem:[%s3108_s5] sm:$0xff]   ;;  %vm809_vm7 = vcmask 261120  }
  0x71   : > { %s3123_s29 = smov (!%p506_p3, %s2055_s29), 3  ;;  %v520_v3 = vadd.s32 8, %v519_v2  ;;  %v525_v4 = vand.u32 15, %v519_v2  ;;  %2210 = vmatpush3.bf16.msra.mxu1 %v642_v17  ;;  %2215 = vmatprep.subr.bf16.mxu0 %v2677_v1  ;;  %v702_v19 = vsel %vm593_vm1, %v697_v18, 0  ;;  %v2430_v33 = vld [vmem:[%s3108_s5 + $0x8] sm:$0xff]   ;;  %v2434_v14 = vld [vmem:[#allocation12 + $0x18] sm:$0xff]  }
  0x72   : > { %s2056_s25 = sshll.u32 %s3123_s29, 3  ;;  %2221 = vmatprep.subr.bf16.mxu1 %v2677_v1  ;;  %v2064_v43 = vld [vmem:[#allocation4] ss:$0 sm:$0xff]  ;;  %v2065_v47 = vld [vmem:[#allocation6] ss:$0 sm:$0xff]  ;;  %v2438_v17 = vld [vmem:[#allocation12] sm:$0xff]  }
  0x73   : > { %s509_s30 = scalar_lea.vmem %s3103_s0, %s2056_s25  ;;  %v545_v5 = vadd.s32 4294967295, %v525_v4  ;;  %v532_v9 = vand.u32 15, %v520_v3  ;;  %v2066_v51 = vld [vmem:[#allocation7] ss:$0 sm:$0xff]  ;;  %v2431_v63 = vld [vmem:[%s3108_s5 + $0x28] sm:$0xff]  }
  0x74   : > { %v569_v7 = vld [vmem:[%s509_s30] sm:$0xff]  ;;  %v570_v8 = vld [vmem:[%s509_s30 + $0x8] sm:$0xff]  ;;  %s515_s30 = scalar_lea.vmem %s3115_s12, %s2056_s25 }
  0x75   : > { %v573_v11 = vrot.slane %v570_v8, 7  ;;  %v577_v12 = vrot.slane %v569_v7, 7  ;;  %v586_v13 = vpack.c.bf16 %v570_v8, %v569_v7  ;;  %v686_v15 = vrot.slane %v569_v7, 1 }
  0x76   : > { %v687_v16 = vrot.slane %v570_v8, 1  ;;  %vm547_vm5 = vcmp.ge.s32.totalorder %v545_v5, 0  ;;  %v558_v24 = vadd.s32 1, %v532_v9  ;;  %v2433_v8 = vld [vmem:[%s3108_s5 + $0x20] sm:$0xff]  }
  0x77   : > { %v2893_v20 = vsel %vm547_vm5, 1.0, %v2677_v1  ;;  %v578_v21 = vsel %vm576_vm3, %v577_v12, %v573_v11  ;;  %v581_v22 = vsel %vm576_vm3, %v573_v11, %v577_v12  ;;  %2206 = vmatmul.mubr.msk.bf16.vlgmr.msra.gmra.mxu0 %vm589_vm2, %v586_v13 }
  0x78   : > { %v582_v23 = vmul.f32 %v2893_v20, %v581_v22  ;;  %v692_v25 = vsel %vm685_vm4, %v687_v16, %v686_v15  ;;  %2216 = vmatpush3.bf16.msra.mxu0 %v702_v19  ;;  %2217 = vmatprep.mubr.msk.bf16.mxu0 %vm2678_vm0, %v2677_v1  ;;  %vm562_vm6 = vcmp.lt.s32.totalorder %v558_v24, 16  ;;  %v688_v28 = vsel %vm685_vm4, %v686_v15, %v687_v16  ;;  %v2435_v15 = vld [vmem:[#allocation12 + $0x10] sm:$0xff]   ;;  %v2436_v16 = vld [vmem:[#allocation12 + $0x8] sm:$0xff]  }
  0x79   : > { %v2904_v27 = vsel %vm562_vm6, 1.0, %v2677_v1  ;;  %2229 = vmatprep.subr.bf16.mxu0 %v2677_v1 }
  0x7a   : > { %v584_v26 = vpack.c.bf16 %v578_v21, %v582_v23  ;;  %v694_v29 = vmul.f32 %v2904_v27, %v692_v25 }
  0x7c   : > { %2212 = vmatmul.mubr.msk.bf16.vlgmr.msra.gmra.mxu1 %vm589_vm2, %v584_v26  ;;  %v695_v30 = vpack.c.bf16 %v694_v29, %v688_v28  ;;  %v2084_v28 = vld [vmem:[#allocation9] ss:$0 sm:$0xff] }
  0x7d   : > { %2225 = vmatprep.mubr.msk.bf16.mxu1 %vm2678_vm0, %v2677_v1  ;;  %2222 = vmatpush3.bf16.msra.mxu1 %v2428_v31  ;;  %v2085_v31 = vld [vmem:[#allocation10] ss:$0 sm:$0xff] }
  0x7e   : > { %2223 = vmatprep.subr.bf16.mxu1 %v2677_v1 }
  0x7f   : > { %2218 = vmatmul.mubr.msk.bf16.vlgmr.msra.gmra.mxu0 %vm589_vm2, %v695_v30 }
  0x80   : > { %2233 = vmatprep.mubr.msk.bf16.mxu0 %vm2678_vm0, %v2677_v1  ;;  %2230 = vmatpush3.bf16.msra.mxu0 %v2430_v33 }
  0x81   : > { %2224 = vmatpush3.bf16.msra.mxu1 %v2429_v32  ;;  %2231 = vmatprep.subr.bf16.mxu0 %v2677_v1 }
  0x82   : > { %2237 = vmatprep.subr.bf16.mxu1 %v2677_v1 }
  0x84   : > { %2232 = vmatpush3.bf16.msra.mxu0 %v2432_v34 }
  0x85   : > { %2245 = vmatprep.subr.bf16.mxu0 %v2677_v1 }
 0x137   : > { %v631_v35 = vpop.f32.mrf.mxu0 }
 0x139   : > { %v2207_v36 = vpop.f32.mrf.mxu0 }
 0x13b   : > { %v634_v38 = vpop.f32.mrf.mxu0 }
 0x13c   : > { %v678_v37 = vpop.f32.mrf.mxu1 }
 0x13d   : > { %v2208_v40 = vpop.f32.mrf.mxu0  ;;  %v679_v41 = vadd.f32 %v678_v37, %v631_v35 }
 0x13e   : > { %v2213_v39 = vpop.f32.mrf.mxu1 }
 0x13f   : > { %v738_v44 = vpop.f32.mrf.mxu0 }
 0x140   : > { %v681_v42 = vpop.f32.mrf.mxu1  ;;  %v745_v45 = vadd.f32 %v738_v44, %v679_v41 }
 0x141   : > { %v2219_v48 = vpop.f32.mrf.mxu0  ;;  %v682_v49 = vadd.f32 %v681_v42, %v634_v38 }
 0x142   : > { %v2214_v46 = vpop.f32.mrf.mxu1  ;;  %v2931_v50 = vadd.f32 %v2064_v43, %v745_v45  ;;  %v2437_v45 = vld [vmem:[#allocation12 + $0x28] sm:$0xff]  }
 0x143   : > { %v741_v52 = vpop.f32.mrf.mxu0 }
 0x144   : > { %v762_v53 = vmul.f32 %v2065_v47, %v2931_v50  ;;  %v746_v54 = vadd.f32 %v741_v52, %v682_v49 }
 0x145   : > { %v2220_v55 = vpop.f32.mrf.mxu0 }
 0x146   : > { %v771_v56 = vadd.f32 %v2066_v51, %v762_v53  ;;  %v2934_v57 = vadd.f32 %v2064_v43, %v746_v54  ;;  %v2439_v54 = vld [vmem:[#allocation12 + $0x20] sm:$0xff]  }
 0x148   : > { %v763_v58 = vmul.f32 %v2065_v47, %v2934_v57  ;;  %v773_v59 = vmax.f32 %v771_v56, 0.0 }
 0x14a   : > { %v772_v60 = vadd.f32 %v2066_v51, %v763_v58  ;;  %v779_v62 = vrot.slane %v773_v59, 7  ;;  %v910_v0 = vrot.slane %v773_v59, 1 }
 0x14c   : > { %v774_v61 = vmax.f32 %v772_v60, 0.0 }
 0x14e   : > { %v776_v2 = vrot.slane %v774_v61, 7  ;;  %v791_v3 = vpack.c.bf16 %v774_v61, %v773_v59  ;;  %v911_v4 = vrot.slane %v774_v61, 1  ;;  %v2440_v61 = vld [vmem:[%s3108_s5 + $0x48] sm:$0xff]  }
 0x150   : > { %2226 = vmatmul.mubr.msk.bf16.vlgmr.msra.gmra.mxu1 %vm809_vm7, %v791_v3  ;;  %v783_v5 = vsel %vm576_vm3, %v776_v2, %v779_v62  ;;  %v916_v6 = vsel %vm685_vm4, %v911_v4, %v910_v0  ;;  %v780_v9 = vsel %vm576_vm3, %v779_v62, %v776_v2  ;;  %v912_v12 = vsel %vm685_vm4, %v910_v0, %v911_v4  ;;  %v2441_v62 = vld [vmem:[%s3108_s5 + $0x40] sm:$0xff]   ;;  %v2444_v0 = vld [vmem:[%s3108_s5 + $0x30] sm:$0xff]  }
 0x151   : > { %2238 = vmatpush3.bf16.msra.mxu1 %v2431_v63  ;;  %v784_v7 = vmul.f32 %v2893_v20, %v783_v5  ;;  %2241 = vmatprep.mubr.msk.bf16.mxu1 %vm2678_vm0, %v2677_v1  ;;  %v918_v10 = vmul.f32 %v2904_v27, %v916_v6  ;;  %v2442_v63 = vld [vmem:[%s3108_s5 + $0x38] sm:$0xff]  }
 0x152   : > { %2239 = vmatprep.subr.bf16.mxu1 %v2677_v1 }
 0x153   : > { %v786_v11 = vpack.c.bf16 %v780_v9, %v784_v7  ;;  %v919_v13 = vpack.c.bf16 %v918_v10, %v912_v12  ;;  %v2095_v9 = vld [vmem:[%s3112_s9] ss:$0 sm:$0xff] }
 0x155   : > { %2234 = vmatmul.mubr.msk.bf16.vlgmr.msra.gmra.mxu0 %vm809_vm7, %v786_v11  ;;  %2240 = vmatpush3.bf16.msra.mxu1 %v2433_v8 }
 0x156   : > { %2253 = vmatprep.subr.bf16.mxu1 %v2677_v1  ;;  %2249 = vmatprep.mubr.msk.bf16.mxu0 %vm2678_vm0, %v2677_v1 }
 0x157   : > { %2246 = vmatpush3.bf16.msra.mxu0 %v2434_v14 }
 0x158   : > { %2242 = vmatmul.mubr.msk.bf16.vlgmr.msra.gmra.mxu1 %vm809_vm7, %v919_v13  ;;  %2247 = vmatprep.subr.bf16.mxu0 %v2677_v1 }
 0x159   : > { %2257 = vmatprep.mubr.msk.bf16.mxu1 %vm2678_vm0, %v2677_v1  ;;  %2254 = vmatpush3.bf16.msra.mxu1 %v2436_v16 }
 0x15a   : > { %2255 = vmatprep.subr.bf16.mxu1 %v2677_v1 }
 0x15b   : > { %2248 = vmatpush3.bf16.msra.mxu0 %v2435_v15 }
 0x15c   : > { %2261 = vmatprep.subr.bf16.mxu0 %v2677_v1 }
 0x15d   : > { %2256 = vmatpush3.bf16.msra.mxu1 %v2438_v17  ;;  %v2096_v17 = vld [vmem:[#allocation6 + $0x1] ss:$0 sm:$0xff] }
 0x15e   : > { %2269 = vmatprep.subr.bf16.mxu1 %v2677_v1 }
 0x210   : > { %v847_v18 = vpop.f32.mrf.mxu1 }
 0x212   : > { %v2227_v19 = vpop.f32.mrf.mxu1 }
 0x214   : > { %v850_v21 = vpop.f32.mrf.mxu1 }
 0x215   : > { %v903_v22 = vpop.f32.mrf.mxu0 }
 0x216   : > { %v904_v23 = vadd.f32 %v903_v22, %v847_v18  ;;  %v2228_v24 = vpop.f32.mrf.mxu1  ;;  %v2097_v22 = vld [vmem:[#allocation7 + $0x1] ss:$0 sm:$0xff] }
 0x217   : > { %v2235_v25 = vpop.f32.mrf.mxu0 }
 0x218   : > { %v974_v26 = vpop.f32.mrf.mxu1 }
 0x219   : > { %v981_v29 = vadd.f32 %v974_v26, %v904_v23  ;;  %v906_v30 = vpop.f32.mrf.mxu0 }
 0x21a   : > { %v907_v32 = vadd.f32 %v906_v30, %v850_v21  ;;  %v2243_v33 = vpop.f32.mrf.mxu1 }
 0x21b   : > { %v990_v34 = vmul.f32 %v2084_v28, %v981_v29  ;;  %v2236_v35 = vpop.f32.mrf.mxu0 }
 0x21c   : > { %v977_v36 = vpop.f32.mrf.mxu1 }
 0x21d   : > { %v999_v37 = vadd.f32 %v2085_v31, %v990_v34  ;;  %v982_v38 = vadd.f32 %v977_v36, %v907_v32 }
 0x21e   : > { %v2244_v39 = vpop.f32.mrf.mxu1 }
 0x21f   : > { %v991_v40 = vmul.f32 %v2084_v28, %v982_v38  ;;  %v1001_v41 = vmax.f32 %v999_v37, 0.0 }
 0x221   : > { %v1000_v42 = vadd.f32 %v2085_v31, %v991_v40  ;;  %v1008_v44 = vrot.slane %v1001_v41, 7  ;;  %v1138_v46 = vrot.slane %v1001_v41, 1  ;;  %v2445_v40 = vld [vmem:[%s3108_s5 + $0x50] sm:$0xff]  }
 0x223   : > { %v1002_v43 = vmax.f32 %v1000_v42, 0.0 }
 0x225   : > { %v1005_v47 = vrot.slane %v1002_v43, 7  ;;  %v1020_v48 = vpack.c.bf16 %v1002_v43, %v1001_v41  ;;  %v1139_v49 = vrot.slane %v1002_v43, 1 }
 0x227   : > { %v1012_v51 = vsel %vm576_vm3, %v1005_v47, %v1008_v44  ;;  %v1144_v52 = vsel %vm685_vm4, %v1139_v49, %v1138_v46  ;;  %2250 = vmatmul.mubr.msk.bf16.vlgmr.msra.gmra.mxu0 %vm809_vm7, %v1020_v48  ;;  %v1009_v55 = vsel %vm576_vm3, %v1008_v44, %v1005_v47  ;;  %v1140_v59 = vsel %vm685_vm4, %v1138_v46, %v1139_v49  ;;  %v2446_v46 = vld [vmem:[#allocation12 + $0x48] sm:$0xff]   ;;  %v2447_v47 = vld [vmem:[#allocation12 + $0x40] sm:$0xff]   ;;  %v2448_v48 = vld [vmem:[#allocation12 + $0x38] sm:$0xff]  }
 0x228   : > { %2262 = vmatpush3.bf16.msra.mxu0 %v2437_v45  ;;  %v1013_v53 = vmul.f32 %v2893_v20, %v1012_v51  ;;  %2265 = vmatprep.mubr.msk.bf16.mxu0 %vm2678_vm0, %v2677_v1  ;;  %v1146_v56 = vmul.f32 %v2904_v27, %v1144_v52  ;;  %v2450_v49 = vld [vmem:[#allocation12 + $0x30] sm:$0xff]  }
 0x229   : > { %2263 = vmatprep.subr.bf16.mxu0 %v2677_v1 }
 0x22a   : > { %v1015_v58 = vpack.c.bf16 %v1009_v55, %v1013_v53  ;;  %v1147_v60 = vpack.c.bf16 %v1146_v56, %v1140_v59 }
 0x22c   : > { %2258 = vmatmul.mubr.msk.bf16.vlgmr.msra.gmra.mxu1 %vm809_vm7, %v1015_v58  ;;  %2264 = vmatpush3.bf16.msra.mxu0 %v2439_v54 }
 0x22d   : > { %2277 = vmatprep.subr.bf16.mxu0 %v2677_v1  ;;  %2273 = vmatprep.mubr.msk.bf16.mxu1 %vm2678_vm0, %v2677_v1 }
 0x22e   : > { %2270 = vmatpush3.bf16.msra.mxu1 %v2440_v61 }
 0x22f   : > { %2266 = vmatmul.mubr.msk.bf16.vlgmr.msra.gmra.mxu0 %vm809_vm7, %v1147_v60  ;;  %2271 = vmatprep.subr.bf16.mxu1 %v2677_v1  ;;  %v2119_v60 = vld [vmem:[#allocation9 + $0x1] ss:$0 sm:$0xff] }
 0x230   : > { %2281 = vmatprep.mubr.msk.bf16.mxu0 %vm2678_vm0, %v2677_v1  ;;  %2278 = vmatpush3.bf16.msra.mxu0 %v2442_v63  ;;  %v2120_v63 = vld [vmem:[#allocation10 + $0x1] ss:$0 sm:$0xff] }
 0x231   : > { %2279 = vmatprep.subr.bf16.mxu0 %v2677_v1 }
 0x232   : > { %2272 = vmatpush3.bf16.msra.mxu1 %v2441_v62 }
 0x233   : > { %2285 = vmatprep.subr.bf16.mxu1 %v2677_v1 }
 0x234   : > { %2280 = vmatpush3.bf16.msra.mxu0 %v2444_v0 }
 0x235   : > { %2293 = vmatprep.subr.bf16.mxu0 %v2677_v1 }
 0x2e7   : > { %v1075_v2 = vpop.f32.mrf.mxu0 }
 0x2e9   : > { %v2251_v3 = vpop.f32.mrf.mxu0 }
 0x2eb   : > { %v1078_v4 = vpop.f32.mrf.mxu0 }
 0x2ec   : > { %v1131_v5 = vpop.f32.mrf.mxu1 }
 0x2ed   : > { %v1132_v6 = vadd.f32 %v1131_v5, %v1075_v2  ;;  %v2252_v7 = vpop.f32.mrf.mxu0 }
 0x2ee   : > { %v2259_v8 = vpop.f32.mrf.mxu1 }
 0x2ef   : > { %v1202_v10 = vpop.f32.mrf.mxu0 }
 0x2f0   : > { %v1209_v11 = vadd.f32 %v1202_v10, %v1132_v6  ;;  %v1134_v12 = vpop.f32.mrf.mxu1 }
 0x2f1   : > { %v1135_v13 = vadd.f32 %v1134_v12, %v1078_v4  ;;  %v2267_v14 = vpop.f32.mrf.mxu0 }
 0x2f2   : > { %v1217_v15 = vadd.f32 %v2095_v9, %v1209_v11  ;;  %v2260_v16 = vpop.f32.mrf.mxu1  ;;  %v2449_v14 = vld [vmem:[#allocation12 + $0x58] sm:$0xff]  }
 0x2f3   : > { %v1205_v18 = vpop.f32.mrf.mxu0 }
 0x2f4   : > { %v3001_v19 = vadd.f32 %v1217_v15, %v2931_v50  ;;  %v1210_v21 = vadd.f32 %v1205_v18, %v1135_v13  ;;  %v2443_v50 = vld [vmem:[%s3108_s5 + $0x58] sm:$0xff]  }
 0x2f5   : > { %v2268_v23 = vpop.f32.mrf.mxu0 }
 0x2f6   : > { %v1229_v24 = vmul.f32 %v2096_v17, %v3001_v19  ;;  %v1218_v25 = vadd.f32 %v2095_v9, %v1210_v21 }
 0x2f8   : > { %v1239_v26 = vadd.f32 %v2097_v22, %v1229_v24  ;;  %v3005_v28 = vadd.f32 %v1218_v25, %v2934_v57  ;;  %v2451_v24 = vld [vmem:[#allocation12 + $0x50] sm:$0xff]  }
 0x2fa   : > { %v1230_v29 = vmul.f32 %v2096_v17, %v3005_v28  ;;  %v1241_v30 = vmax.f32 %v1239_v26, 0.0 }
 0x2fc   : > { %v1240_v31 = vadd.f32 %v2097_v22, %v1230_v29  ;;  %v1247_v33 = vrot.slane %v1241_v30, 7  ;;  %v1378_v34 = vrot.slane %v1241_v30, 1 }
 0x2fe   : > { %v1242_v32 = vmax.f32 %v1240_v31, 0.0 }
 0x300   : > { %v1244_v35 = vrot.slane %v1242_v32, 7  ;;  %v1379_v36 = vrot.slane %v1242_v32, 1  ;;  %v1260_v37 = vpack.c.bf16 %v1242_v32, %v1241_v30  ;;  %v2452_v32 = vld [vmem:[%s3113_s10 + $0x18] sm:$0xff]  }
 0x302   : > { %2274 = vmatmul.mubr.msk.bf16.vlgmr.msra.gmra.mxu1 %vm809_vm7, %v1260_v37  ;;  %v1251_v38 = vsel %vm576_vm3, %v1244_v35, %v1247_v33  ;;  %v1384_v57 = vsel %vm685_vm4, %v1379_v36, %v1378_v34  ;;  %v1248_v41 = vsel %vm576_vm3, %v1247_v33, %v1244_v35  ;;  %v1380_v44 = vsel %vm685_vm4, %v1378_v34, %v1379_v36  ;;  %v2453_v33 = vld [vmem:[%s3113_s10 + $0x10] sm:$0xff]   ;;  %v2456_v34 = vld [vmem:[%s3113_s10] sm:$0xff]  }
 0x303   : > { %2286 = vmatpush3.bf16.msra.mxu1 %v2443_v50  ;;  %v1252_v39 = vmul.f32 %v2893_v20, %v1251_v38  ;;  %2289 = vmatprep.mubr.msk.bf16.mxu1 %vm2678_vm0, %v2677_v1  ;;  %v1386_v42 = vmul.f32 %v2904_v27, %v1384_v57  ;;  %v2454_v50 = vld [vmem:[%s3113_s10 + $0x8] sm:$0xff]  }
 0x304   : > { %2287 = vmatprep.subr.bf16.mxu1 %v2677_v1 }
 0x305   : > { %v1254_v43 = vpack.c.bf16 %v1248_v41, %v1252_v39  ;;  %v1387_v45 = vpack.c.bf16 %v1386_v42, %v1380_v44  ;;  %v2131_v41 = vld [vmem:[%s3112_s9 + $0x1] ss:$0 sm:$0xff] }
 0x307   : > { %2282 = vmatmul.mubr.msk.bf16.vlgmr.msra.gmra.mxu0 %vm809_vm7, %v1254_v43  ;;  %2288 = vmatpush3.bf16.msra.mxu1 %v2445_v40 }
 0x308   : > { %2301 = vmatprep.subr.bf16.mxu1 %v2677_v1  ;;  %2297 = vmatprep.mubr.msk.bf16.mxu0 %vm2678_vm0, %v2677_v1 }
 0x309   : > { %2294 = vmatpush3.bf16.msra.mxu0 %v2446_v46 }
 0x30a   : > { %2290 = vmatmul.mubr.msk.bf16.vlgmr.msra.gmra.mxu1 %vm809_vm7, %v1387_v45  ;;  %2295 = vmatprep.subr.bf16.mxu0 %v2677_v1 }
 0x30b   : > { %2305 = vmatprep.mubr.msk.bf16.mxu1 %vm2678_vm0, %v2677_v1  ;;  %2302 = vmatpush3.bf16.msra.mxu1 %v2448_v48 }
 0x30c   : > { %2303 = vmatprep.subr.bf16.mxu1 %v2677_v1 }
 0x30d   : > { %2296 = vmatpush3.bf16.msra.mxu0 %v2447_v47 }
 0x30e   : > { %2309 = vmatprep.subr.bf16.mxu0 %v2677_v1 }
 0x30f   : > { %2304 = vmatpush3.bf16.msra.mxu1 %v2450_v49 }
 0x310   : > { %2317 = vmatprep.subr.bf16.mxu1 %v2677_v1 }
 0x3c2   : > { %v1315_v51 = vpop.f32.mrf.mxu1 }
 0x3c4   : > { %v2275_v52 = vpop.f32.mrf.mxu1 }
 0x3c6   : > { %v1318_v53 = vpop.f32.mrf.mxu1 }
 0x3c7   : > { %v1371_v54 = vpop.f32.mrf.mxu0 }
 0x3c8   : > { %v1372_v55 = vadd.f32 %v1371_v54, %v1315_v51  ;;  %v2276_v56 = vpop.f32.mrf.mxu1 }
 0x3c9   : > { %v2283_v58 = vpop.f32.mrf.mxu0 }
 0x3ca   : > { %v1442_v59 = vpop.f32.mrf.mxu1  ;;  %v2455_v58 = vld [vmem:[%s3113_s10 + $0x28] sm:$0xff]  }
 0x3cb   : > { %v1449_v61 = vadd.f32 %v1442_v59, %v1372_v55  ;;  %v1374_v62 = vpop.f32.mrf.mxu0 }
 0x3cc   : > { %v1375_v0 = vadd.f32 %v1374_v62, %v1318_v53  ;;  %v2291_v2 = vpop.f32.mrf.mxu1 }
 0x3cd   : > { %v1459_v3 = vmul.f32 %v2119_v60, %v1449_v61  ;;  %v2284_v4 = vpop.f32.mrf.mxu0 }
 0x3ce   : > { %v1445_v5 = vpop.f32.mrf.mxu1 }
 0x3cf   : > { %v1469_v6 = vadd.f32 %v2120_v63, %v1459_v3  ;;  %v1450_v7 = vadd.f32 %v1445_v5, %v1375_v0 }
 0x3d0   : > { %v2292_v8 = vpop.f32.mrf.mxu1 }
 0x3d1   : > { %v1460_v9 = vmul.f32 %v2119_v60, %v1450_v7  ;;  %v1471_v10 = vmax.f32 %v1469_v6, 0.0 }
 0x3d3   : > { %v1470_v11 = vadd.f32 %v2120_v63, %v1460_v9  ;;  %v1479_v13 = vrot.slane %v1471_v10, 7  ;;  %v1610_v15 = vrot.slane %v1471_v10, 1 }
 0x3d5   : > { %v1472_v12 = vmax.f32 %v1470_v11, 0.0 }
 0x3d7   : > { %v1476_v16 = vrot.slane %v1472_v12, 7  ;;  %v1492_v17 = vpack.c.bf16 %v1472_v12, %v1471_v10  ;;  %v1611_v18 = vrot.slane %v1472_v12, 1 }
 0x3d9   : > { %v1483_v21 = vsel %vm576_vm3, %v1476_v16, %v1479_v13  ;;  %v1616_v22 = vsel %vm685_vm4, %v1611_v18, %v1610_v15  ;;  %2298 = vmatmul.mubr.msk.bf16.vlgmr.msra.gmra.mxu0 %vm809_vm7, %v1492_v17  ;;  %v1480_v25 = vsel %vm576_vm3, %v1479_v13, %v1476_v16  ;;  %v1612_v30 = vsel %vm685_vm4, %v1610_v15, %v1611_v18 }
 0x3da   : > { %2310 = vmatpush3.bf16.msra.mxu0 %v2449_v14  ;;  %v1484_v23 = vmul.f32 %v2893_v20, %v1483_v21  ;;  %2313 = vmatprep.mubr.msk.bf16.mxu0 %vm2678_vm0, %v2677_v1  ;;  %v1618_v26 = vmul.f32 %v2904_v27, %v1616_v22 }
 0x3db   : > { %2311 = vmatprep.subr.bf16.mxu0 %v2677_v1 }
 0x3dc   : > { %v1486_v29 = vpack.c.bf16 %v1480_v25, %v1484_v23  ;;  %v1619_v31 = vpack.c.bf16 %v1618_v26, %v1612_v30 }
 0x3de   : > { %2306 = vmatmul.mubr.msk.bf16.vlgmr.msra.gmra.mxu1 %vm809_vm7, %v1486_v29  ;;  %2312 = vmatpush3.bf16.msra.mxu0 %v2451_v24 }
 0x3df   : > { %2325 = vmatprep.subr.bf16.mxu0 %v2677_v1  ;;  %2321 = vmatprep.mubr.msk.bf16.mxu1 %vm2678_vm0, %v2677_v1 }
 0x3e0   : > { %2318 = vmatpush3.bf16.msra.mxu1 %v2452_v32 }
 0x3e1   : > { %2314 = vmatmul.mubr.msk.bf16.vlgmr.msra.gmra.mxu0 %vm809_vm7, %v1619_v31  ;;  %2319 = vmatprep.subr.bf16.mxu1 %v2677_v1 }
 0x3e2   : > { %2329 = vmatprep.mubr.msk.bf16.mxu0 %vm2678_vm0, %v2677_v1  ;;  %2326 = vmatpush3.bf16.msra.mxu0 %v2454_v50 }
 0x3e3   : > { %2327 = vmatprep.subr.bf16.mxu0 %v2677_v1 }
 0x3e4   : > { %2320 = vmatpush3.bf16.msra.mxu1 %v2453_v33 }
 0x3e5   : > { %2333 = vmatprep.subr.bf16.mxu1 %v2677_v1 }
 0x3e6   : > { %2328 = vmatpush3.bf16.msra.mxu0 %v2456_v34 }
 0x499   : > { %v1547_v35 = vpop.f32.mrf.mxu0 }
 0x49b   : > { %v2299_v36 = vpop.f32.mrf.mxu0 }
 0x49d   : > { %v1550_v37 = vpop.f32.mrf.mxu0 }
 0x49e   : > { %v1603_v38 = vpop.f32.mrf.mxu1 }
 0x49f   : > { %v1604_v57 = vadd.f32 %v1603_v38, %v1547_v35  ;;  %v2300_v39 = vpop.f32.mrf.mxu0 }
 0x4a0   : > { %v2307_v40 = vpop.f32.mrf.mxu1 }
 0x4a1   : > { %v1674_v42 = vpop.f32.mrf.mxu0 }
 0x4a2   : > { %v1681_v43 = vadd.f32 %v1674_v42, %v1604_v57  ;;  %v1606_v44 = vpop.f32.mrf.mxu1 }
 0x4a3   : > { %v1607_v45 = vadd.f32 %v1606_v44, %v1550_v37  ;;  %v2315_v46 = vpop.f32.mrf.mxu0 }
 0x4a4   : > { %v1689_v47 = vadd.f32 %v2131_v41, %v1681_v43  ;;  %v2308_v48 = vpop.f32.mrf.mxu1 }
 0x4a5   : > { %v1677_v49 = vpop.f32.mrf.mxu0 }
 0x4a6   : > { %v1682_v51 = vadd.f32 %v1677_v49, %v1607_v45  ;;  %v1691_v52 = vadd.f32 %v1689_v47, %v3001_v19 }
 0x4a7   : > { %v2316_v53 = vpop.f32.mrf.mxu0 }
 0x4a8   : > { %v1690_v54 = vadd.f32 %v2131_v41, %v1682_v51  ;;  %v1698_v56 = vrot.slane %v1691_v52, 7  ;;  %v1828_v59 = vrot.slane %v1691_v52, 1 }
 0x4aa   : > { %v1692_v55 = vadd.f32 %v1690_v54, %v3005_v28  ;;  %v2457_v28 = vld [vmem:[%s3113_s10 + $0x20] sm:$0xff]  }
 0x4ac   : > { %v1695_v60 = vrot.slane %v1692_v55, 7  ;;  %v1710_v61 = vpack.c.bf16 %v1692_v55, %v1691_v52  ;;  %v1829_v62 = vrot.slane %v1692_v55, 1 }
 0x4ae   : > { %v1702_v63 = vsel %vm576_vm3, %v1695_v60, %v1698_v56  ;;  %v1834_v0 = vsel %vm685_vm4, %v1829_v62, %v1828_v59  ;;  %2322 = vmatmul.mubr.msk.bf16.vlgmr.msra.gmra.mxu1 %vm809_vm7, %v1710_v61  ;;  %v1699_v2 = vsel %vm576_vm3, %v1698_v56, %v1695_v60 }
 0x4af   : > { %2334 = vmatpush3.bf16.msra.mxu1 %v2455_v58  ;;  %v1703_v19 = vmul.f32 %v2893_v20, %v1702_v63  ;;  %2337 = vmatprep.mubr.msk.bf16.mxu1 %vm2678_vm0, %v2677_v1  ;;  %v1836_v3 = vmul.f32 %v2904_v27, %v1834_v0  ;;  %v1830_v20 = vsel %vm685_vm4, %v1828_v59, %v1829_v62  ;;  %v2149_v27 = vld [vmem:[%s3114_s11] ss:$0 sm:$0xff] }
 0x4b0   : > { %2335 = vmatprep.subr.bf16.mxu1 %v2677_v1 }
 0x4b1   : > { %v1705_v4 = vpack.c.bf16 %v1699_v2, %v1703_v19  ;;  %v1837_v5 = vpack.c.bf16 %v1836_v3, %v1830_v20 }
 0x4b3   : > { %2330 = vmatmul.mubr.msk.bf16.vlgmr.msra.gmra.mxu0 %vm809_vm7, %v1705_v4  ;;  %2336 = vmatpush3.bf16.msra.mxu1 %v2457_v28 }
 0x4b6   : > { %2338 = vmatmul.mubr.msk.bf16.vlgmr.msra.gmra.mxu1 %vm809_vm7, %v1837_v5 }
 0x56e   : > { %v1765_v6 = vpop.f32.mrf.mxu1 }
 0x570   : > { %v2323_v7 = vpop.f32.mrf.mxu1 }
 0x572   : > { %v1768_v8 = vpop.f32.mrf.mxu1 }
 0x573   : > { %v1821_v9 = vpop.f32.mrf.mxu0 }
 0x574   : > { %v1822_v10 = vadd.f32 %v1821_v9, %v1765_v6  ;;  %v2324_v1 = vpop.f32.mrf.mxu1 }
 0x575   : > { %v2331_v11 = vpop.f32.mrf.mxu0 }
 0x576   : > { %v1892_v12 = vpop.f32.mrf.mxu1 }
 0x577   : > { %v1899_v13 = vadd.f32 %v1892_v12, %v1822_v10  ;;  %v1824_v14 = vpop.f32.mrf.mxu0 }
 0x578   : > { %v1825_v15 = vadd.f32 %v1824_v14, %v1768_v8  ;;  %v2339_v16 = vpop.f32.mrf.mxu1 }
 0x579   : > { %v1907_v17 = vadd.f32 %v2149_v27, %v1899_v13  ;;  %v2332_v18 = vpop.f32.mrf.mxu0 }
 0x57a   : > { %v1895_v21 = vpop.f32.mrf.mxu1 }
 0x57b   : > { %1909 = vst.msk [vmem:[%s515_s30] sm:$0xff] %vm589_vm2, %v1907_v17  ;;  %v1900_v22 = vadd.f32 %v1895_v21, %v1825_v15 }
 0x57c   : > { %v2340_v23 = vpop.f32.mrf.mxu1 }
 0x57d   : > { %v1908_v24 = vadd.f32 %v2149_v27, %v1900_v22 }
 0x57f   : > { %1910 = vst.msk [vmem:[%s515_s30 + $0x8] sm:$0xff] %vm589_vm2, %v1908_v24 }
 0x580 PF: > { %s26_s21 = sadd.s32 1, %s2662_s21  }
 0x581   : > { %p23_p2 = scmp.ge.s32.totalorder %s26_s21, 4  }
 0x583   :  { %25 = sbr.rel (!%p23_p2) target bundleno = 4 (0x4), region = 146 }
 0x588   :  { %1933 = vsyncpa [#allocation3], 1 }
 0x589   :  { %1935 = vsyncpa [#allocation3 + $0x1], 1 }
 0x58a   :  { %1936 = vsyncpa [#allocation5], 1 }
 0x58b   :  { %1937 = vsyncpa [#allocation8], 1 }
 0x58c   :  { %1938 = vsyncpa [#allocation11], 1 }

</bundles_post_ra>
